<compile_context>
chip_gen: v7x
topology: tpu7x:2x2x1
jax: 0.10.0
libtpu: 0.0.40
codegen_flags: <defaults>
</compile_context>

<pallas_src>
import jax
import jax.numpy as jnp
from jax.experimental import pallas as pl
from jax.experimental.pallas import tpu as pltpu


_DEFAULT_HW_TILE = 1024          # lanes per block (multiple of 128); ~86% of HBM roofline
_VMEM_LIMIT_BYTES = 32 * 1024 * 1024   # covers double-buffered tiles on v5e's 16 MiB default


def _pick_hw_tile(hw, t_max):
    # Full extent if it fits (always legal for a BlockSpec); otherwise a
    # 128-multiple tile, with pl.cdiv grid + Pallas boundary masking.
    return hw if hw <= t_max else t_max


def _conv1x1_kernel(x_ref, w_ref, b_ref, o_ref):
    # x_ref: (1, Cin, T)  w_ref: (Cout, Cin)  b_ref: (Cout, 1)  o_ref: (1, Cout, T)
    acc = jnp.dot(w_ref[...], x_ref[0], preferred_element_type=jnp.float32)
    o_ref[0] = (acc + b_ref[...]).astype(o_ref.dtype)


def _conv1x1_pair_kernel(x_ref, y_ref, w1_ref, w2_ref, b1_ref, b2_ref,
                         ox_ref, oy_ref):
    ox_ref[0] = (jnp.dot(w1_ref[...], x_ref[0], preferred_element_type=jnp.float32)
                 + b1_ref[...]).astype(ox_ref.dtype)
    oy_ref[0] = (jnp.dot(w2_ref[...], y_ref[0], preferred_element_type=jnp.float32)
                 + b2_ref[...]).astype(oy_ref.dtype)


def conv1x1_nchw(x, weight_oi, bias_o, *, hw_tile=_DEFAULT_HW_TILE):
    """NCHW-native 1x1 conv (stride 1, pad 0): out[n,o,hw] = sum_c W[o,c]*x[n,c,hw] + b[o]."""
    N, Cin, H, W = x.shape
    Cout = weight_oi.shape[0]
    HW = H * W
    t = _pick_hw_tile(HW, hw_tile)

    x3 = x.reshape(N, Cin, HW)                       # contiguous reshape, no transpose
    w = weight_oi.astype(jnp.float32)                # (Cout, Cin)
    b = bias_o.reshape(Cout, 1).astype(jnp.float32)  # broadcast over lanes in-kernel

    out3 = pl.pallas_call(
        _conv1x1_kernel,
        out_shape=jax.ShapeDtypeStruct((N, Cout, HW), jnp.float32),
        grid_spec=pltpu.PrefetchScalarGridSpec(
            num_scalar_prefetch=0,
            grid=(N, pl.cdiv(HW, t)),
            in_specs=[
                pl.BlockSpec((1, Cin, t), lambda n, h: (n, 0, h)),
                pl.BlockSpec((Cout, Cin), lambda n, h: (0, 0)),   # resident weight
                pl.BlockSpec((Cout, 1), lambda n, h: (0, 0)),     # resident bias
            ],
            out_specs=pl.BlockSpec((1, Cout, t), lambda n, h: (n, 0, h)),
        ),
        compiler_params=pltpu.CompilerParams(
            dimension_semantics=("parallel", "parallel"),
            vmem_limit_bytes=_VMEM_LIMIT_BYTES,
        ),
    )(x3, w, b)
    return out3.reshape(N, Cout, H, W)


def conv1x1_pair_nchw(x, y, w1, b1, w2, b2, *, hw_tile=_DEFAULT_HW_TILE):
    """Both convs of NodeModule fused into one pallas_call (same-shaped x, y)."""
    assert x.shape == y.shape, "fused path requires matching input shapes"
    N, Cin, H, W = x.shape
    Cout = w1.shape[0]
    HW = H * W
    t = _pick_hw_tile(HW, hw_tile)

    x3 = x.reshape(N, Cin, HW)
    y3 = y.reshape(N, Cin, HW)
    b1c = b1.reshape(Cout, 1).astype(jnp.float32)
    b2c = b2.reshape(Cout, 1).astype(jnp.float32)

    act_spec = pl.BlockSpec((1, Cin, t), lambda n, h: (n, 0, h))
    w_spec = pl.BlockSpec((Cout, Cin), lambda n, h: (0, 0))
    b_spec = pl.BlockSpec((Cout, 1), lambda n, h: (0, 0))
    out_spec = pl.BlockSpec((1, Cout, t), lambda n, h: (n, 0, h))

    ox3, oy3 = pl.pallas_call(
        _conv1x1_pair_kernel,
        out_shape=(jax.ShapeDtypeStruct((N, Cout, HW), jnp.float32),
                   jax.ShapeDtypeStruct((N, Cout, HW), jnp.float32)),
        grid_spec=pltpu.PrefetchScalarGridSpec(
            num_scalar_prefetch=0,
            grid=(N, pl.cdiv(HW, t)),
            in_specs=[act_spec, act_spec, w_spec, w_spec, b_spec, b_spec],
            out_specs=[out_spec, out_spec],
        ),
        compiler_params=pltpu.CompilerParams(
            dimension_semantics=("parallel", "parallel"),
            vmem_limit_bytes=_VMEM_LIMIT_BYTES,
        ),
    )(x3, y3, w1.astype(jnp.float32), w2.astype(jnp.float32), b1c, b2c)
    return ox3.reshape(N, Cout, H, W), oy3.reshape(N, Cout, H, W)


class NodeModulePallas:
    """Mirrors the PyTorch NodeModule: two independent 1x1 convs 768 -> 64."""

    def __init__(self, key):
        k1, k2, k3, k4 = jax.random.split(key, 4)
        cin, cout = 768, 64
        bound = 1.0 / (cin ** 0.5)
        self.w1 = jax.random.uniform(k1, (cout, cin), jnp.float32, -bound, bound)
        self.b1 = jax.random.uniform(k2, (cout,), jnp.float32, -bound, bound)
        self.w2 = jax.random.uniform(k3, (cout, cin), jnp.float32, -bound, bound)
        self.b2 = jax.random.uniform(k4, (cout,), jnp.float32, -bound, bound)

    def __call__(self, x, y):
        if x.shape == y.shape:
            return conv1x1_pair_nchw(x, y, self.w1, self.b1, self.w2, self.b2)
        # Fallback for differently-shaped inputs (still allowed by the module).
        return (conv1x1_nchw(x, self.w1, self.b1),
                conv1x1_nchw(y, self.w2, self.b2))


if __name__ == "__main__":
    key = jax.random.PRNGKey(0)
    kx, ky, kp = jax.random.split(key, 3)

    # Small shapes consistent with the module: Cin must be 768.
    N, Cin, H, W = 2, 768, 8, 8
    x = jax.random.normal(kx, (N, Cin, H, W), jnp.float32)
    y = jax.random.normal(ky, (N, Cin, H, W), jnp.float32)

    model = NodeModulePallas(kp)
    out_x, out_y = model(x, y)
    jax.block_until_ready((out_x, out_y))

    # Reference check against plain-JAX 1x1 conv (einsum over channels).
    ref_x = jnp.einsum("nchw,oc->nohw", x, model.w1) + model.b1[None, :, None, None]
    ref_y = jnp.einsum("nchw,oc->nohw", y, model.w2) + model.b2[None, :, None, None]
    assert out_x.shape == (N, 64, H, W) and out_y.shape == (N, 64, H, W)
    assert jnp.allclose(out_x, ref_x, atol=1e-4, rtol=1e-4)
    assert jnp.allclose(out_y, ref_y, atol=1e-4, rtol=1e-4)

    # Also exercise the single-conv (non-fused) path once for coverage.
    out_x2 = conv1x1_nchw(x, model.w1, model.b1)
    jax.block_until_ready(out_x2)
    assert jnp.allclose(out_x2, ref_x, atol=1e-4, rtol=1e-4)

    print("KERNEL_OK")
</pallas_src>

<mosaic_0001>
module attributes {stable_mosaic.version = 11 : i64} {
  func.func @_conv1x1_pair_kernel(%arg0: i32, %arg1: i32, %arg2: memref<1x768x64xf32, #tpu.memory_space<vmem>>, %arg3: memref<1x768x64xf32, #tpu.memory_space<vmem>>, %arg4: memref<64x768xf32, #tpu.memory_space<vmem>>, %arg5: memref<64x768xf32, #tpu.memory_space<vmem>>, %arg6: memref<64x1xf32, #tpu.memory_space<vmem>>, %arg7: memref<64x1xf32, #tpu.memory_space<vmem>>, %arg8: memref<1x64x64xf32, #tpu.memory_space<vmem>>, %arg9: memref<1x64x64xf32, #tpu.memory_space<vmem>>) attributes {dimension_semantics = [#tpu.dimension_semantics<parallel>, #tpu.dimension_semantics<parallel>], iteration_bounds = array<i64: 2, 1>, scalar_prefetch = 0 : i64, scratch_operands = 0 : i64, tpu.core_type = #tpu.core_type<tc>, window_params = [{transform_indices = @transform_0, window_bounds = array<i64: 1, 768, 64>}, {transform_indices = @transform_1, window_bounds = array<i64: 1, 768, 64>}, {pipeline_mode = #tpu.pipeline_mode<synchronous>, transform_indices = @transform_2, window_bounds = array<i64: 64, 768>}, {pipeline_mode = #tpu.pipeline_mode<synchronous>, transform_indices = @transform_3, window_bounds = array<i64: 64, 768>}, {pipeline_mode = #tpu.pipeline_mode<synchronous>, transform_indices = @transform_4, window_bounds = array<i64: 64, 1>}, {pipeline_mode = #tpu.pipeline_mode<synchronous>, transform_indices = @transform_5, window_bounds = array<i64: 64, 1>}, {transform_indices = @transform_6, window_bounds = array<i64: 1, 64, 64>}, {transform_indices = @transform_7, window_bounds = array<i64: 1, 64, 64>}]} {
    %c0 = arith.constant 0 : index
    %c0_0 = arith.constant 0 : index
    %0 = vector.load %arg4[%c0, %c0_0] : memref<64x768xf32, #tpu.memory_space<vmem>>, vector<64x768xf32>
    %c0_1 = arith.constant 0 : index
    %c0_2 = arith.constant 0 : index
    %c0_3 = arith.constant 0 : index
    %1 = vector.load %arg2[%c0_1, %c0_2, %c0_3] : memref<1x768x64xf32, #tpu.memory_space<vmem>>, vector<1x768x64xf32>
    %2 = vector.shape_cast %1 : vector<1x768x64xf32> to vector<768x64xf32>
    %cst = arith.constant dense<0.000000e+00> : vector<64x64xf32>
    %3 = tpu.matmul %0, %2, %cst {dimension_numbers = #tpu.dot_dimension_numbers<[1], [0], [0], [1], [0, 0, 1, 1], [], []>} : vector<64x768xf32>, vector<768x64xf32>, vector<64x64xf32> -> vector<64x64xf32>
    %c0_4 = arith.constant 0 : index
    %c0_5 = arith.constant 0 : index
    %4 = vector.load %arg6[%c0_4, %c0_5] : memref<64x1xf32, #tpu.memory_space<vmem>>, vector<64x1xf32>
    %5 = vector.broadcast %4 : vector<64x1xf32> to vector<64x64xf32>
    %6 = arith.addf %3, %5 : vector<64x64xf32>
    %c0_6 = arith.constant 0 : index
    %c0_7 = arith.constant 0 : index
    %c0_8 = arith.constant 0 : index
    %7 = vector.load %arg8[%c0_6, %c0_7, %c0_8] : memref<1x64x64xf32, #tpu.memory_space<vmem>>, vector<1x64x64xf32>
    %8 = vector.shape_cast %7 : vector<1x64x64xf32> to vector<64x64xf32>
    %9 = vector.shape_cast %6 : vector<64x64xf32> to vector<1x64x64xf32>
    tpu.vector_store %arg8[%c0_6, %c0_7, %c0_8], %9 {strides = array<i32>} : memref<1x64x64xf32, #tpu.memory_space<vmem>>, vector<1x64x64xf32>,
    %c0_9 = arith.constant 0 : index
    %c0_10 = arith.constant 0 : index
    %10 = vector.load %arg5[%c0_9, %c0_10] : memref<64x768xf32, #tpu.memory_space<vmem>>, vector<64x768xf32>
    %c0_11 = arith.constant 0 : index
    %c0_12 = arith.constant 0 : index
    %c0_13 = arith.constant 0 : index
    %11 = vector.load %arg3[%c0_11, %c0_12, %c0_13] : memref<1x768x64xf32, #tpu.memory_space<vmem>>, vector<1x768x64xf32>
    %12 = vector.shape_cast %11 : vector<1x768x64xf32> to vector<768x64xf32>
    %cst_14 = arith.constant dense<0.000000e+00> : vector<64x64xf32>
    %13 = tpu.matmul %10, %12, %cst_14 {dimension_numbers = #tpu.dot_dimension_numbers<[1], [0], [0], [1], [0, 0, 1, 1], [], []>} : vector<64x768xf32>, vector<768x64xf32>, vector<64x64xf32> -> vector<64x64xf32>
    %c0_15 = arith.constant 0 : index
    %c0_16 = arith.constant 0 : index
    %14 = vector.load %arg7[%c0_15, %c0_16] : memref<64x1xf32, #tpu.memory_space<vmem>>, vector<64x1xf32>
    %15 = vector.broadcast %14 : vector<64x1xf32> to vector<64x64xf32>
    %16 = arith.addf %13, %15 : vector<64x64xf32>
    %c0_17 = arith.constant 0 : index
    %c0_18 = arith.constant 0 : index
    %c0_19 = arith.constant 0 : index
    %17 = vector.load %arg9[%c0_17, %c0_18, %c0_19] : memref<1x64x64xf32, #tpu.memory_space<vmem>>, vector<1x64x64xf32>
    %18 = vector.shape_cast %17 : vector<1x64x64xf32> to vector<64x64xf32>
    %19 = vector.shape_cast %16 : vector<64x64xf32> to vector<1x64x64xf32>
    tpu.vector_store %arg9[%c0_17, %c0_18, %c0_19], %19 {strides = array<i32>} : memref<1x64x64xf32, #tpu.memory_space<vmem>>, vector<1x64x64xf32>,
    return
  }
  func.func @transform_0(%arg0: i32, %arg1: i32) -> (i32, i32, i32) {
    %c0_i32 = arith.constant 0 : i32
    %c0_i32_0 = arith.constant 0 : i32
    return %arg0, %c0_i32, %arg1 : i32, i32, i32
  }
  func.func @transform_1(%arg0: i32, %arg1: i32) -> (i32, i32, i32) {
    %c0_i32 = arith.constant 0 : i32
    %c0_i32_0 = arith.constant 0 : i32
    return %arg0, %c0_i32, %arg1 : i32, i32, i32
  }
  func.func @transform_2(%arg0: i32, %arg1: i32) -> (i32, i32) {
    %c0_i32 = arith.constant 0 : i32
    %c0_i32_0 = arith.constant 0 : i32
    %c0_i32_1 = arith.constant 0 : i32
    return %c0_i32, %c0_i32_0 : i32, i32
  }
  func.func @transform_3(%arg0: i32, %arg1: i32) -> (i32, i32) {
    %c0_i32 = arith.constant 0 : i32
    %c0_i32_0 = arith.constant 0 : i32
    %c0_i32_1 = arith.constant 0 : i32
    return %c0_i32, %c0_i32_0 : i32, i32
  }
  func.func @transform_4(%arg0: i32, %arg1: i32) -> (i32, i32) {
    %c0_i32 = arith.constant 0 : i32
    %c0_i32_0 = arith.constant 0 : i32
    %c0_i32_1 = arith.constant 0 : i32
    return %c0_i32, %c0_i32_0 : i32, i32
  }
  func.func @transform_5(%arg0: i32, %arg1: i32) -> (i32, i32) {
    %c0_i32 = arith.constant 0 : i32
    %c0_i32_0 = arith.constant 0 : i32
    %c0_i32_1 = arith.constant 0 : i32
    return %c0_i32, %c0_i32_0 : i32, i32
  }
  func.func @transform_6(%arg0: i32, %arg1: i32) -> (i32, i32, i32) {
    %c0_i32 = arith.constant 0 : i32
    %c0_i32_0 = arith.constant 0 : i32
    return %arg0, %c0_i32, %arg1 : i32, i32, i32
  }
  func.func @transform_7(%arg0: i32, %arg1: i32) -> (i32, i32, i32) {
    %c0_i32 = arith.constant 0 : i32
    %c0_i32_0 = arith.constant 0 : i32
    return %arg0, %c0_i32, %arg1 : i32, i32, i32
  }
}

</mosaic_0001>

<bundles_post_ra>
// kernel: tpu_custom_call.1
= control target key start
LH: loop header
LB: loop body
LE: loop exit
PB: predicated region body
PF: predicated region fallthrough
CT: control target
= control target key end

     0   :  { %13 = vsyncpa [#allocation3], 0  ;;  %s3105_s0 = inlined_call_operand.vmem [shape: f32[2,768,64], index: 0, kind: input, shape index: {}]   ;;  %s3106_s1 = inlined_call_operand.vmem [shape: f32[2,768,64], index: 1, kind: input, shape index: {}]   ;;  %s3107_s2 = inlined_call_operand.vmem [shape: f32[64,768], index: 2, kind: input, shape index: {}]   ;;  %s3108_s3 = inlined_call_operand.vmem [shape: f32[64,768], index: 3, kind: input, shape index: {}]   ;;  %s3109_s4 = inlined_call_operand.vmem [shape: f32[64,1], index: 4, kind: input, shape index: {}]   ;;  %s3110_s5 = inlined_call_operand.vmem [shape: f32[64,1], index: 5, kind: input, shape index: {}]   ;;  %s3111_s6 = inlined_call_operand.hbm [shape: f32[2,64,64], index: 6, kind: output, shape index: {0}]   ;;  %s3112_s7 = inlined_call_operand.hbm [shape: f32[2,64,64], index: 7, kind: output, shape index: {1}]  }
   0x1   :  { %15 = vsyncpa [#allocation3 + $0x1], 0 }
   0x2   :  { %16 = vsyncpa [#allocation5], 0 }
   0x3   :  { %18 = vsyncpa [#allocation5 + $0x1], 0  ;;  %s2314_s24 = smov 0   ;;  %s2316_s25 = smov 0  }
   0x4   :  { %s2318_s26 = smov 0   ;;  %s2320_s27 = smov 0  }
   0x5   :  { %s2322_s28 = smov 0   ;;  %s2324_s29 = smov 0  }
   0x6 LB: > { %s1544_s30 = sadd.s32 4294967295, %s2267_s29   ;;  %s1545_s8 = sadd.s32 4294967294, %s2267_s29   ;;  %s2267_s29 = sphi %s2324_s29, %s24_s29   ;;  %s2263_s28 = sphi %s2322_s28, %s3121_s28   ;;  %s2259_s27 = sphi %s2320_s27, %s3120_s27   ;;  %s2255_s26 = sphi %s2318_s26, %s3119_s26   ;;  %s2251_s25 = sphi %s2316_s25, %s3118_s25   ;;  %s2247_s24 = sphi %s2314_s24, %s3117_s24  }
   0x7   : > { %s36_s9 = sadd.s32 1, %s2263_s28  ;;  %s185_s10 = sadd.s32 1, %s2255_s26 }
   0x8   : > { %p38_p0 = scmp.ge.s32.totalorder %s36_s9, 2  ;;  %p195_p1 = scmp.ne.s32.totalorder %s2255_s26, %s2251_s25 }
   0x9   : > { %p196_p2 = scmp.eq.s32.totalorder %s1544_s30, 1  ;;  %p201_p3 = scmp.ne.s32.totalorder %s2251_s25, %s2247_s24 }
   0xa   : > { %s3123_s9 = smov (%p38_p0, %s36_s9), 0  ;;  %p202_p5 = scmp.eq.s32.totalorder %s1545_s8, 1 }
   0xb   : > { %p2354_p4 = por %p196_p2, %p195_p1  ;;  %s180_s12 = ssub.s32 %s2263_s28, %s3123_s9 }
   0xc   : > { %p1548_p6 = scmp.ge.s32.totalorder %s2267_s29, 1  ;;  %p183_p7 = scmp.eq.s32.totalorder %s180_s12, 0 }
   0xd   : > { %p2361_p8 = por %p202_p5, %p201_p3  ;;  %p282_p9 = scmp.lt.s32.totalorder %s2267_s29, 3 }
   0xe   : > { %s2367_s14 = scalar_select %p183_p7, %s2255_s26, %s185_s10  }
   0xf   : > { %p283_p10 = pnand %p1548_p6, %p282_p9 }
  0x10   : > { %p330_p11 = scmp.lt.s32.totalorder (!%p283_p10), %s2259_s27, 1  ;;  %v347_v0 = vld [vmem:[%s3107_s2 + $0x8] sm:$0xff] (!%p283_p10)  ;;  %v349_v1 = vld [vmem:[%s3107_s2 + $0x18] sm:$0xff] (!%p283_p10)  ;;  %v2269_v2 = vmov (!%p283_p10), 0   ;;  %vm853_vm0 = vcmask (!%p283_p10), 523264   ;;  %s3113_s17 = sshll.u32 (!%p283_p10), %s2259_s27, 10 }
  0x11   : > { %286 = sbr.rel (%p283_p10) target bundleno = 393 (0x189), region = 44  ;;  %602 = vmatprep.mubr.f32.mxu0 (!%p283_p10), %v347_v0  ;;  %707 = vmatprep.mubr.f32.mxu1 (!%p283_p10), %v349_v1  ;;  %s2984_s21 = scalar_lea.hbm (!%p283_p10), %s3111_s6, %s3113_s17 }
  0x12   : > { %2155 = vset.pattern.permute.xlu0 (!%p283_p10), %v2269_v2  ;;  %2156 = vset.pattern.permute.xlu1 (!%p283_p10), %v2269_v2  ;;  %s2270_s30 = smov (!%p283_p10), [#allocation2]  }
  0x13   : > { %s2161_s8 = sshll.u32 (!%p283_p10), %s2270_s30, 4  ;;  %s2162_s8 = int_to_ptr.vmem [resolvable:$false] %s2161_s8 }
  0x14   : > { %s2163_s12 = scalar_lea.vmem (!%p283_p10), %s2162_s8, 2048 }
  0x18   : > { %s2377_s19 = scalar_select %p330_p11, %s2259_s27, 1 }
  0x1a   : > { %s2091_s20 = smul.u32 768, %s2377_s19 }
  0x1c   : > { %s2385_s23 = scalar_lea.vmem %s3105_s0, %s2091_s20  ;;  %s2452_s10 = scalar_lea.vmem %s3106_s1, %s2091_s20 }
  0x1d   : > { %v410_v3 = vld [vmem:[%s2385_s23 + $0x80] sm:$0xff]  ;;  %v411_v4 = vld [vmem:[%s2385_s23 + $0x88] sm:$0xff]  ;;  %v412_v14 = vld [vmem:[%s2385_s23 + $0x90] sm:$0xff] }
  0x1e   : > { %v394_v5 = vld [vmem:[%s2385_s23] sm:$0xff]  ;;  %v1899_v6 = vpack.c.bf16 %v411_v4, %v410_v3  ;;  %v395_v7 = vld [vmem:[%s2385_s23 + $0x8] sm:$0xff]  ;;  %v413_v16 = vld [vmem:[%s2385_s23 + $0x98] sm:$0xff] }
  0x1f   : > { %v442_v8 = vld [vmem:[%s2385_s23 + $0x180] sm:$0xff]  ;;  %v443_v9 = vld [vmem:[%s2385_s23 + $0x188] sm:$0xff]  ;;  %v1901_v10 = vpack.c.bf16 %v395_v7, %v394_v5  ;;  %v396_v17 = vld [vmem:[%s2385_s23 + $0x10] sm:$0xff]  ;;  %v1903_v19 = vpack.c.bf16 %v413_v16, %v412_v14 }
  0x20   : > { %v1931_v11 = vpack.c.bf16 %v443_v9, %v442_v8  ;;  %v426_v12 = vld [vmem:[%s2385_s23 + $0x100] sm:$0xff]  ;;  %v427_v13 = vld [vmem:[%s2385_s23 + $0x108] sm:$0xff]  ;;  %1900 = vmatprep.subr.bf16.mxu0 %v1899_v6  ;;  %v397_v18 = vld [vmem:[%s2385_s23 + $0x18] sm:$0xff] }
  0x21   : > { %v1933_v15 = vpack.c.bf16 %v427_v13, %v426_v12  ;;  %1902 = vmatpush3.bf16.msra.mxu0 %v1901_v10  ;;  %v1905_v20 = vpack.c.bf16 %v397_v18, %v396_v17  ;;  %v444_v21 = vld [vmem:[%s2385_s23 + $0x190] sm:$0xff]  ;;  %v445_v22 = vld [vmem:[%s2385_s23 + $0x198] sm:$0xff]  ;;  %v414_v26 = vld [vmem:[%s2385_s23 + $0xa0] sm:$0xff] }
  0x22   : > { %1932 = vmatprep.subr.bf16.mxu1 %v1931_v11  ;;  %v428_v23 = vld [vmem:[%s2385_s23 + $0x110] sm:$0xff]  ;;  %v1935_v24 = vpack.c.bf16 %v445_v22, %v444_v21  ;;  %v429_v25 = vld [vmem:[%s2385_s23 + $0x118] sm:$0xff]  ;;  %v415_v27 = vld [vmem:[%s2385_s23 + $0xa8] sm:$0xff]  ;;  %1904 = vmatprep.subr.bf16.mxu0 %v1903_v19 }
  0x23   : > { %1934 = vmatpush3.bf16.msra.mxu1 %v1933_v15  ;;  %v1937_v28 = vpack.c.bf16 %v429_v25, %v428_v23  ;;  %v1907_v29 = vpack.c.bf16 %v415_v27, %v414_v26  ;;  %v398_v30 = vld [vmem:[%s2385_s23 + $0x20] sm:$0xff]  ;;  %v399_v31 = vld [vmem:[%s2385_s23 + $0x28] sm:$0xff]  ;;  %v416_v38 = vld [vmem:[%s2385_s23 + $0xb0] sm:$0xff] }
  0x24   : > { %v446_v32 = vld [vmem:[%s2385_s23 + $0x1a0] sm:$0xff]  ;;  %1936 = vmatprep.subr.bf16.mxu1 %v1935_v24  ;;  %v447_v33 = vld [vmem:[%s2385_s23 + $0x1a8] sm:$0xff]  ;;  %v1909_v36 = vpack.c.bf16 %v399_v31, %v398_v30  ;;  %v417_v39 = vld [vmem:[%s2385_s23 + $0xb8] sm:$0xff] }
  0x25   : > { %v430_v34 = vld [vmem:[%s2385_s23 + $0x120] sm:$0xff]  ;;  %v431_v35 = vld [vmem:[%s2385_s23 + $0x128] sm:$0xff]  ;;  %1906 = vmatpush3.bf16.msra.mxu0 %v1905_v20  ;;  %v1939_v37 = vpack.c.bf16 %v447_v33, %v446_v32  ;;  %v400_v40 = vld [vmem:[%s2385_s23 + $0x30] sm:$0xff]  ;;  %v1911_v42 = vpack.c.bf16 %v417_v39, %v416_v38 }
  0x26   : > { %1908 = vmatprep.subr.bf16.mxu0 %v1907_v29  ;;  %v1941_v41 = vpack.c.bf16 %v431_v35, %v430_v34  ;;  %v401_v43 = vld [vmem:[%s2385_s23 + $0x38] sm:$0xff]  ;;  %v448_v44 = vld [vmem:[%s2385_s23 + $0x1b0] sm:$0xff]  ;;  %v418_v49 = vld [vmem:[%s2385_s23 + $0xc0] sm:$0xff] }
  0x27   : > { %1938 = vmatpush3.bf16.msra.mxu1 %v1937_v28  ;;  %v449_v45 = vld [vmem:[%s2385_s23 + $0x1b8] sm:$0xff]  ;;  %v432_v47 = vld [vmem:[%s2385_s23 + $0x130] sm:$0xff]  ;;  %v419_v50 = vld [vmem:[%s2385_s23 + $0xc8] sm:$0xff]  ;;  %v1913_v51 = vpack.c.bf16 %v401_v43, %v400_v40 }
  0x28   : > { %1940 = vmatprep.subr.bf16.mxu1 %v1939_v37  ;;  %v1943_v46 = vpack.c.bf16 %v449_v45, %v448_v44  ;;  %v433_v48 = vld [vmem:[%s2385_s23 + $0x138] sm:$0xff]  ;;  %v450_v52 = vld [vmem:[%s2385_s23 + $0x1c0] sm:$0xff]  ;;  %v451_v53 = vld [vmem:[%s2385_s23 + $0x1c8] sm:$0xff]  ;;  %v1915_v55 = vpack.c.bf16 %v419_v50, %v418_v49 }
  0x29   : > { %1910 = vmatpush3.bf16.msra.mxu0 %v1909_v36  ;;  %v1945_v54 = vpack.c.bf16 %v433_v48, %v432_v47  ;;  %v402_v56 = vld [vmem:[%s2385_s23 + $0x40] sm:$0xff]  ;;  %v403_v57 = vld [vmem:[%s2385_s23 + $0x48] sm:$0xff]  ;;  %v1947_v59 = vpack.c.bf16 %v451_v53, %v450_v52  ;;  %v420_v61 = vld [vmem:[%s2385_s23 + $0xd0] sm:$0xff] }
  0x2a   : > { %1912 = vmatprep.subr.bf16.mxu0 %v1911_v42  ;;  %v434_v58 = vld [vmem:[%s2385_s23 + $0x140] sm:$0xff]  ;;  %v435_v60 = vld [vmem:[%s2385_s23 + $0x148] sm:$0xff]  ;;  %v421_v62 = vld [vmem:[%s2385_s23 + $0xd8] sm:$0xff]  ;;  %v1917_v1 = vpack.c.bf16 %v403_v57, %v402_v56 }
  0x2b   : > { %1942 = vmatpush3.bf16.msra.mxu1 %v1941_v41  ;;  %v452_v63 = vld [vmem:[%s2385_s23 + $0x1d0] sm:$0xff]  ;;  %v453_v0 = vld [vmem:[%s2385_s23 + $0x1d8] sm:$0xff]  ;;  %v1949_v2 = vpack.c.bf16 %v435_v60, %v434_v58  ;;  %v1919_v3 = vpack.c.bf16 %v421_v62, %v420_v61  ;;  %v422_v9 = vld [vmem:[%s2385_s23 + $0xe0] sm:$0xff] }
  0x2c   : > { %1944 = vmatprep.subr.bf16.mxu1 %v1943_v46  ;;  %v404_v4 = vld [vmem:[%s2385_s23 + $0x50] sm:$0xff]  ;;  %v405_v5 = vld [vmem:[%s2385_s23 + $0x58] sm:$0xff]  ;;  %v1951_v7 = vpack.c.bf16 %v453_v0, %v452_v63  ;;  %v423_v10 = vld [vmem:[%s2385_s23 + $0xe8] sm:$0xff] }
  0x2d   : > { %1914 = vmatpush3.bf16.msra.mxu0 %v1913_v51  ;;  %v436_v6 = vld [vmem:[%s2385_s23 + $0x150] sm:$0xff]  ;;  %v437_v8 = vld [vmem:[%s2385_s23 + $0x158] sm:$0xff]  ;;  %v454_v11 = vld [vmem:[%s2385_s23 + $0x1e0] sm:$0xff]  ;;  %v1921_v13 = vpack.c.bf16 %v405_v5, %v404_v4  ;;  %v1923_v15 = vpack.c.bf16 %v423_v10, %v422_v9 }
  0x2e   : > { %1916 = vmatprep.subr.bf16.mxu0 %v1915_v55  ;;  %v455_v12 = vld [vmem:[%s2385_s23 + $0x1e8] sm:$0xff]  ;;  %v1953_v14 = vpack.c.bf16 %v437_v8, %v436_v6  ;;  %v406_v16 = vld [vmem:[%s2385_s23 + $0x60] sm:$0xff]  ;;  %v424_v21 = vld [vmem:[%s2385_s23 + $0xf0] sm:$0xff] }
  0x2f   : > { %1946 = vmatpush3.bf16.msra.mxu1 %v1945_v54  ;;  %v407_v17 = vld [vmem:[%s2385_s23 + $0x68] sm:$0xff]  ;;  %v438_v18 = vld [vmem:[%s2385_s23 + $0x160] sm:$0xff]  ;;  %v1955_v19 = vpack.c.bf16 %v455_v12, %v454_v11  ;;  %v425_v22 = vld [vmem:[%s2385_s23 + $0xf8] sm:$0xff] }
  0x30   : > { %1948 = vmatprep.subr.bf16.mxu1 %v1947_v59  ;;  %v439_v20 = vld [vmem:[%s2385_s23 + $0x168] sm:$0xff]  ;;  %v456_v23 = vld [vmem:[%s2385_s23 + $0x1f0] sm:$0xff]  ;;  %v457_v24 = vld [vmem:[%s2385_s23 + $0x1f8] sm:$0xff]  ;;  %v1925_v25 = vpack.c.bf16 %v407_v17, %v406_v16  ;;  %v1927_v27 = vpack.c.bf16 %v425_v22, %v424_v21 }
  0x31   : > { %1918 = vmatpush3.bf16.msra.mxu0 %v1917_v1  ;;  %v1957_v26 = vpack.c.bf16 %v439_v20, %v438_v18  ;;  %v408_v28 = vld [vmem:[%s2385_s23 + $0x70] sm:$0xff]  ;;  %v409_v29 = vld [vmem:[%s2385_s23 + $0x78] sm:$0xff]  ;;  %v1959_v31 = vpack.c.bf16 %v457_v24, %v456_v23  ;;  %v474_v33 = vld [vmem:[%s2385_s23 + $0x280] sm:$0xff] }
  0x32   : > { %1920 = vmatprep.subr.bf16.mxu0 %v1919_v3  ;;  %v440_v30 = vld [vmem:[%s2385_s23 + $0x170] sm:$0xff]  ;;  %v441_v32 = vld [vmem:[%s2385_s23 + $0x178] sm:$0xff]  ;;  %v475_v34 = vld [vmem:[%s2385_s23 + $0x288] sm:$0xff]  ;;  %v1929_v37 = vpack.c.bf16 %v409_v29, %v408_v28 }
  0x33   : > { %1950 = vmatpush3.bf16.msra.mxu1 %v1949_v2  ;;  %v926_v35 = vld [vmem:[%s2452_s10 + $0x80] sm:$0xff]  ;;  %v927_v36 = vld [vmem:[%s2452_s10 + $0x88] sm:$0xff]  ;;  %v1961_v38 = vpack.c.bf16 %v441_v32, %v440_v30  ;;  %v1963_v39 = vpack.c.bf16 %v475_v34, %v474_v33  ;;  %v476_v45 = vld [vmem:[%s2385_s23 + $0x290] sm:$0xff] }
  0x34   : > { %1952 = vmatprep.subr.bf16.mxu1 %v1951_v7  ;;  %v458_v40 = vld [vmem:[%s2385_s23 + $0x200] sm:$0xff]  ;;  %v459_v41 = vld [vmem:[%s2385_s23 + $0x208] sm:$0xff]  ;;  %v1995_v42 = vpack.c.bf16 %v927_v36, %v926_v35  ;;  %v477_v46 = vld [vmem:[%s2385_s23 + $0x298] sm:$0xff] }
  0x35   : > { %1922 = vmatpush3.bf16.msra.mxu0 %v1921_v13  ;;  %v910_v43 = vld [vmem:[%s2452_s10] sm:$0xff]  ;;  %v911_v44 = vld [vmem:[%s2452_s10 + $0x8] sm:$0xff]  ;;  %v1965_v48 = vpack.c.bf16 %v459_v41, %v458_v40  ;;  %v928_v49 = vld [vmem:[%s2452_s10 + $0x90] sm:$0xff]  ;;  %v1967_v56 = vpack.c.bf16 %v477_v46, %v476_v45 }
  0x36   : > { %1924 = vmatprep.subr.bf16.mxu0 %v1923_v15  ;;  %v346_v47 = vld [vmem:[%s3107_s2] sm:$0xff]  ;;  %v929_v50 = vld [vmem:[%s2452_s10 + $0x98] sm:$0xff]  ;;  %v348_v51 = vld [vmem:[%s3107_s2 + $0x10] sm:$0xff]  ;;  %v1997_v52 = vpack.c.bf16 %v911_v44, %v910_v43 }
  0x37   : > { %1954 = vmatpush3.bf16.msra.mxu1 %v1953_v14  ;;  %v460_v53 = vld [vmem:[%s2385_s23 + $0x210] sm:$0xff]  ;;  %v461_v54 = vld [vmem:[%s2385_s23 + $0x218] sm:$0xff]  ;;  %v355_v59 = vld [vmem:[%s3107_s2 + $0x48] sm:$0xff]  ;;  %v1999_v60 = vpack.c.bf16 %v929_v50, %v928_v49 }
  0x38   : > { %1956 = vmatprep.subr.bf16.mxu1 %v1955_v19  ;;  %v353_v55 = vld [vmem:[%s3107_s2 + $0x38] sm:$0xff]  ;;  %v912_v57 = vld [vmem:[%s2452_s10 + $0x10] sm:$0xff]  ;;  %v478_v61 = vld [vmem:[%s2385_s23 + $0x2a0] sm:$0xff]  ;;  %v1969_v0 = vpack.c.bf16 %v461_v54, %v460_v53 }
  0x39   : > { %1926 = vmatpush3.bf16.msra.mxu0 %v1925_v25  ;;  %v913_v58 = vld [vmem:[%s2452_s10 + $0x18] sm:$0xff]  ;;  %v479_v62 = vld [vmem:[%s2385_s23 + $0x2a8] sm:$0xff]  ;;  %v352_v63 = vld [vmem:[%s3107_s2 + $0x30] sm:$0xff] }
  0x3a   : > { %1928 = vmatprep.subr.bf16.mxu0 %v1927_v27  ;;  %v930_v1 = vld [vmem:[%s2452_s10 + $0xa0] sm:$0xff]  ;;  %v931_v2 = vld [vmem:[%s2452_s10 + $0xa8] sm:$0xff]  ;;  %v2001_v4 = vpack.c.bf16 %v913_v58, %v912_v57  ;;  %v1971_v8 = vpack.c.bf16 %v479_v62, %v478_v61  ;;  %v361_v11 = vld [vmem:[%s3107_s2 + $0x78] sm:$0xff] }
  0x3b   : > { %1958 = vmatpush3.bf16.msra.mxu1 %v1957_v26  ;;  %v354_v3 = vld [vmem:[%s3107_s2 + $0x40] sm:$0xff]  ;;  %v463_v6 = vld [vmem:[%s2385_s23 + $0x228] sm:$0xff]  ;;  %v2003_v12 = vpack.c.bf16 %v931_v2, %v930_v1  ;;  %v480_v13 = vld [vmem:[%s2385_s23 + $0x2b0] sm:$0xff] }
  0x3c   : > { %1960 = vmatprep.subr.bf16.mxu1 %v1959_v31  ;;  %v462_v5 = vld [vmem:[%s2385_s23 + $0x220] sm:$0xff]  ;;  %v359_v7 = vld [vmem:[%s3107_s2 + $0x68] sm:$0xff]  ;;  %v481_v14 = vld [vmem:[%s2385_s23 + $0x2b8] sm:$0xff] }
  0x3d   : > { %1930 = vmatpush3.bf16.msra.mxu0 %v1929_v37  ;;  %v914_v9 = vld [vmem:[%s2452_s10 + $0x20] sm:$0xff]  ;;  %v915_v10 = vld [vmem:[%s2452_s10 + $0x28] sm:$0xff]  ;;  %v1973_v16 = vpack.c.bf16 %v463_v6, %v462_v5  ;;  %v932_v17 = vld [vmem:[%s2452_s10 + $0xb0] sm:$0xff]  ;;  %v1975_v24 = vpack.c.bf16 %v481_v14, %v480_v13 }
  0x3e   : > { %1964 = vmatprep.subr.bf16.mxu0 %v1963_v39  ;;  %v358_v15 = vld [vmem:[%s3107_s2 + $0x60] sm:$0xff]  ;;  %v933_v18 = vld [vmem:[%s2452_s10 + $0xb8] sm:$0xff]  ;;  %v360_v19 = vld [vmem:[%s3107_s2 + $0x70] sm:$0xff]  ;;  %v2005_v20 = vpack.c.bf16 %v915_v10, %v914_v9 }
  0x3f   : > { %1962 = vmatpush3.bf16.msra.mxu1 %v1961_v38  ;;  %v464_v21 = vld [vmem:[%s2385_s23 + $0x230] sm:$0xff]  ;;  %v465_v22 = vld [vmem:[%s2385_s23 + $0x238] sm:$0xff]  ;;  %v367_v27 = vld [vmem:[%s3107_s2 + $0xa8] sm:$0xff]  ;;  %v2007_v28 = vpack.c.bf16 %v933_v18, %v932_v17 }
  0x40   : > { %1996 = vmatprep.subr.bf16.mxu1 %v1995_v42  ;;  %603 = vmatmul.mubr.f32.vlgmr.msra.gmra.mrb[0].mxu0 %v346_v47  ;;  %v365_v23 = vld [vmem:[%s3107_s2 + $0x98] sm:$0xff]  ;;  %v916_v25 = vld [vmem:[%s2452_s10 + $0x30] sm:$0xff]  ;;  %v482_v29 = vld [vmem:[%s2385_s23 + $0x2c0] sm:$0xff]  ;;  %v1977_v32 = vpack.c.bf16 %v465_v22, %v464_v21 }
  0x41   : > { %1966 = vmatpush3.bf16.msra.mxu0 %v1965_v48  ;;  %607 = vmatprep.mubr.f32.mxu0 %v353_v55  ;;  %v917_v26 = vld [vmem:[%s2452_s10 + $0x38] sm:$0xff]  ;;  %v483_v30 = vld [vmem:[%s2385_s23 + $0x2c8] sm:$0xff]  ;;  %v364_v31 = vld [vmem:[%s3107_s2 + $0x90] sm:$0xff] }
  0x42   : > { %708 = vmatmul.mubr.f32.vlgmr.msra.gmra.mrb[0].mxu1 %v348_v51  ;;  %1968 = vmatprep.subr.bf16.mxu0 %v1967_v56  ;;  %v934_v33 = vld [vmem:[%s2452_s10 + $0xc0] sm:$0xff]  ;;  %v935_v34 = vld [vmem:[%s2452_s10 + $0xc8] sm:$0xff]  ;;  %v2009_v36 = vpack.c.bf16 %v917_v26, %v916_v25  ;;  %v1979_v40 = vpack.c.bf16 %v483_v30, %v482_v29  ;;  %v373_v43 = vld [vmem:[%s3107_s2 + $0xd8] sm:$0xff] }
  0x43   : > { %1998 = vmatpush3.bf16.msra.mxu1 %v1997_v52  ;;  %712 = vmatprep.mubr.f32.mxu1 %v355_v59  ;;  %v366_v35 = vld [vmem:[%s3107_s2 + $0xa0] sm:$0xff]  ;;  %v467_v38 = vld [vmem:[%s2385_s23 + $0x248] sm:$0xff]  ;;  %v2011_v44 = vpack.c.bf16 %v935_v34, %v934_v33  ;;  %v484_v45 = vld [vmem:[%s2385_s23 + $0x2d0] sm:$0xff] }
  0x44   : > { %608 = vmatmul.mubr.f32.gmra.mrb[2].mxu0 %v352_v63  ;;  %2000 = vmatprep.subr.bf16.mxu1 %v1999_v60  ;;  %v466_v37 = vld [vmem:[%s2385_s23 + $0x240] sm:$0xff]  ;;  %v371_v39 = vld [vmem:[%s3107_s2 + $0xc8] sm:$0xff]  ;;  %v485_v46 = vld [vmem:[%s2385_s23 + $0x2d8] sm:$0xff] }
  0x45   : > { %1970 = vmatpush3.bf16.msra.mxu0 %v1969_v0  ;;  %612 = vmatprep.mubr.f32.mxu0 %v359_v7  ;;  %v918_v41 = vld [vmem:[%s2452_s10 + $0x40] sm:$0xff]  ;;  %v919_v42 = vld [vmem:[%s2452_s10 + $0x48] sm:$0xff]  ;;  %v1981_v48 = vpack.c.bf16 %v467_v38, %v466_v37  ;;  %v936_v49 = vld [vmem:[%s2452_s10 + $0xd0] sm:$0xff]  ;;  %v1983_v56 = vpack.c.bf16 %v485_v46, %v484_v45 }
  0x46   : > { %713 = vmatmul.mubr.f32.gmra.mrb[2].mxu1 %v354_v3  ;;  %1972 = vmatprep.subr.bf16.mxu0 %v1971_v8  ;;  %v370_v47 = vld [vmem:[%s3107_s2 + $0xc0] sm:$0xff]  ;;  %v937_v50 = vld [vmem:[%s2452_s10 + $0xd8] sm:$0xff]  ;;  %v372_v51 = vld [vmem:[%s3107_s2 + $0xd0] sm:$0xff]  ;;  %v2013_v52 = vpack.c.bf16 %v919_v42, %v918_v41 }
  0x47   : > { %2002 = vmatpush3.bf16.msra.mxu1 %v2001_v4  ;;  %717 = vmatprep.mubr.f32.mxu1 %v361_v11  ;;  %v468_v53 = vld [vmem:[%s2385_s23 + $0x250] sm:$0xff]  ;;  %v469_v54 = vld [vmem:[%s2385_s23 + $0x258] sm:$0xff]  ;;  %v379_v59 = vld [vmem:[%s3107_s2 + $0x108] sm:$0xff]  ;;  %v2015_v60 = vpack.c.bf16 %v937_v50, %v936_v49 }
  0x48   : > { %613 = vmatmul.mubr.f32.gmra.mrb[4].mxu0 %v358_v15  ;;  %2004 = vmatprep.subr.bf16.mxu1 %v2003_v12  ;;  %v377_v55 = vld [vmem:[%s3107_s2 + $0xf8] sm:$0xff]  ;;  %v920_v57 = vld [vmem:[%s2452_s10 + $0x50] sm:$0xff]  ;;  %v486_v61 = vld [vmem:[%s2385_s23 + $0x2e0] sm:$0xff]  ;;  %v1985_v0 = vpack.c.bf16 %v469_v54, %v468_v53 }
  0x49   : > { %1974 = vmatpush3.bf16.msra.mxu0 %v1973_v16  ;;  %617 = vmatprep.mubr.f32.mxu0 %v365_v23  ;;  %v921_v58 = vld [vmem:[%s2452_s10 + $0x58] sm:$0xff]  ;;  %v487_v62 = vld [vmem:[%s2385_s23 + $0x2e8] sm:$0xff]  ;;  %v376_v63 = vld [vmem:[%s3107_s2 + $0xf0] sm:$0xff] }
  0x4a   : > { %718 = vmatmul.mubr.f32.gmra.mrb[4].mxu1 %v360_v19  ;;  %1976 = vmatprep.subr.bf16.mxu0 %v1975_v24  ;;  %v938_v1 = vld [vmem:[%s2452_s10 + $0xe0] sm:$0xff]  ;;  %v939_v2 = vld [vmem:[%s2452_s10 + $0xe8] sm:$0xff]  ;;  %v2017_v4 = vpack.c.bf16 %v921_v58, %v920_v57  ;;  %v1987_v8 = vpack.c.bf16 %v487_v62, %v486_v61  ;;  %v385_v11 = vld [vmem:[%s3107_s2 + $0x138] sm:$0xff] }
  0x4b   : > { %2006 = vmatpush3.bf16.msra.mxu1 %v2005_v20  ;;  %722 = vmatprep.mubr.f32.mxu1 %v367_v27  ;;  %v378_v3 = vld [vmem:[%s3107_s2 + $0x100] sm:$0xff]  ;;  %v471_v6 = vld [vmem:[%s2385_s23 + $0x268] sm:$0xff]  ;;  %v2019_v12 = vpack.c.bf16 %v939_v2, %v938_v1  ;;  %v488_v13 = vld [vmem:[%s2385_s23 + $0x2f0] sm:$0xff] }
  0x4c   : > { %618 = vmatmul.mubr.f32.gmra.mrb[6].mxu0 %v364_v31  ;;  %2008 = vmatprep.subr.bf16.mxu1 %v2007_v28  ;;  %v470_v5 = vld [vmem:[%s2385_s23 + $0x260] sm:$0xff]  ;;  %v383_v7 = vld [vmem:[%s3107_s2 + $0x128] sm:$0xff]  ;;  %v489_v14 = vld [vmem:[%s2385_s23 + $0x2f8] sm:$0xff] }
  0x4d   : > { %1978 = vmatpush3.bf16.msra.mxu0 %v1977_v32  ;;  %622 = vmatprep.mubr.f32.mxu0 %v371_v39  ;;  %v922_v9 = vld [vmem:[%s2452_s10 + $0x60] sm:$0xff]  ;;  %v923_v10 = vld [vmem:[%s2452_s10 + $0x68] sm:$0xff]  ;;  %v1989_v16 = vpack.c.bf16 %v471_v6, %v470_v5  ;;  %v940_v17 = vld [vmem:[%s2452_s10 + $0xf0] sm:$0xff]  ;;  %v1991_v24 = vpack.c.bf16 %v489_v14, %v488_v13 }
  0x4e   : > { %723 = vmatmul.mubr.f32.gmra.mrb[6].mxu1 %v366_v35  ;;  %1980 = vmatprep.subr.bf16.mxu0 %v1979_v40  ;;  %v382_v15 = vld [vmem:[%s3107_s2 + $0x120] sm:$0xff]  ;;  %v941_v18 = vld [vmem:[%s2452_s10 + $0xf8] sm:$0xff]  ;;  %v384_v19 = vld [vmem:[%s3107_s2 + $0x130] sm:$0xff]  ;;  %v2021_v20 = vpack.c.bf16 %v923_v10, %v922_v9 }
  0x4f   : > { %2010 = vmatpush3.bf16.msra.mxu1 %v2009_v36  ;;  %727 = vmatprep.mubr.f32.mxu1 %v373_v43  ;;  %v472_v21 = vld [vmem:[%s2385_s23 + $0x270] sm:$0xff]  ;;  %v473_v22 = vld [vmem:[%s2385_s23 + $0x278] sm:$0xff]  ;;  %v391_v27 = vld [vmem:[%s3107_s2 + $0x168] sm:$0xff]  ;;  %v2023_v28 = vpack.c.bf16 %v941_v18, %v940_v17  ;;  %s2929_s23 = sand.u32 1, %s2251_s25  }
  0x50   : > { %623 = vmatmul.mubr.f32.gmra.mrb[8].mxu0 %v370_v47  ;;  %2012 = vmatprep.subr.bf16.mxu1 %v2011_v44  ;;  %v389_v23 = vld [vmem:[%s3107_s2 + $0x158] sm:$0xff]  ;;  %v924_v25 = vld [vmem:[%s2452_s10 + $0x70] sm:$0xff]  ;;  %v958_v29 = vld [vmem:[%s2452_s10 + $0x180] sm:$0xff]  ;;  %v1993_v32 = vpack.c.bf16 %v473_v22, %v472_v21  ;;  %s1549_s15 = sshll.u32 %s2929_s23, 6 }
  0x51   : > { %1982 = vmatpush3.bf16.msra.mxu0 %v1981_v48  ;;  %627 = vmatprep.mubr.f32.mxu0 %v377_v55  ;;  %v925_v26 = vld [vmem:[%s2452_s10 + $0x78] sm:$0xff]  ;;  %v959_v30 = vld [vmem:[%s2452_s10 + $0x188] sm:$0xff]  ;;  %v388_v31 = vld [vmem:[%s3107_s2 + $0x150] sm:$0xff]  ;;  %s2941_s16 = scalar_lea.vmem [#allocation2], %s1549_s15 }
  0x52   : > { %728 = vmatmul.mubr.f32.gmra.mrb[8].mxu1 %v372_v51  ;;  %1984 = vmatprep.subr.bf16.mxu0 %v1983_v56  ;;  %v990_v33 = vld [vmem:[%s2452_s10 + $0x280] sm:$0xff]  ;;  %v991_v34 = vld [vmem:[%s2452_s10 + $0x288] sm:$0xff]  ;;  %v2025_v36 = vpack.c.bf16 %v925_v26, %v924_v25  ;;  %v2027_v40 = vpack.c.bf16 %v959_v30, %v958_v29  ;;  %v960_v45 = vld [vmem:[%s2452_s10 + $0x190] sm:$0xff]  ;;  %s1397_s18 = sshll.u32 %s2941_s16, 4  ;;  %s2986_s18 = int_to_ptr.vmem [resolvable:$true] %s1397_s18 }
  0x53   : > { %2014 = vmatpush3.bf16.msra.mxu1 %v2013_v52  ;;  %732 = vmatprep.mubr.f32.mxu1 %v379_v59  ;;  %v390_v35 = vld [vmem:[%s3107_s2 + $0x160] sm:$0xff]  ;;  %v943_v38 = vld [vmem:[%s2452_s10 + $0x108] sm:$0xff]  ;;  %v2059_v44 = vpack.c.bf16 %v991_v34, %v990_v33  ;;  %v961_v46 = vld [vmem:[%s2452_s10 + $0x198] sm:$0xff]  ;;  %s2157_s22 = scalar_lea.vmem %s2986_s18, 1024  ;;  %p2164_p1 = scmp.lt.s32.totalorder %s2986_s18, %s2162_s8 }
  0x54   : > { %628 = vmatmul.mubr.f32.gmra.mrb[10].mxu0 %v376_v63  ;;  %2016 = vmatprep.subr.bf16.mxu1 %v2015_v60  ;;  %v942_v37 = vld [vmem:[%s2452_s10 + $0x100] sm:$0xff]  ;;  %v351_v39 = vld [vmem:[%s3107_s2 + $0x28] sm:$0xff]  ;;  %v992_v49 = vld [vmem:[%s2452_s10 + $0x290] sm:$0xff]  ;;  %v2031_v56 = vpack.c.bf16 %v961_v46, %v960_v45  ;;  %p2158_p12 = scmp.ne.s32.totalorder %s2986_s18, %s2157_s22  ;;  %p2165_p2 = scmp.lt.s32.totalorder %s2163_s12, %s2157_s22 }
  0x55   : > { %1986 = vmatpush3.bf16.msra.mxu0 %v1985_v0  ;;  %632 = vmatprep.mubr.f32.mxu0 %v383_v7  ;;  %v974_v41 = vld [vmem:[%s2452_s10 + $0x200] sm:$0xff]  ;;  %v975_v42 = vld [vmem:[%s2452_s10 + $0x208] sm:$0xff]  ;;  %v2029_v48 = vpack.c.bf16 %v943_v38, %v942_v37  ;;  %v993_v50 = vld [vmem:[%s2452_s10 + $0x298] sm:$0xff] }
  0x56   : > { %733 = vmatmul.mubr.f32.gmra.mrb[10].mxu1 %v378_v3  ;;  %1988 = vmatprep.subr.bf16.mxu0 %v1987_v8  ;;  %v863_v43 = vld [vmem:[%s3108_s3 + $0x8] sm:$0xff]  ;;  %v350_v47 = vld [vmem:[%s3107_s2 + $0x20] sm:$0xff]  ;;  %v2061_v52 = vpack.c.bf16 %v975_v42, %v974_v41  ;;  %v944_v53 = vld [vmem:[%s2452_s10 + $0x110] sm:$0xff]  ;;  %v2063_v60 = vpack.c.bf16 %v993_v50, %v992_v49  ;;  %p2159_p13 = pnand %p2158_p12, %p2354_p4  ;;  %p2166_p3 = por %p2165_p2, %p2164_p1 }
  0x57   : > { %2018 = vmatpush3.bf16.msra.mxu1 %v2017_v4  ;;  %737 = vmatprep.mubr.f32.mxu1 %v385_v11  ;;  %v862_v51 = vld [vmem:[%s3108_s3] sm:$0xff]  ;;  %v945_v54 = vld [vmem:[%s2452_s10 + $0x118] sm:$0xff]  ;;  %v976_v57 = vld [vmem:[%s2452_s10 + $0x210] sm:$0xff] }
  0x58   : > { %633 = vmatmul.mubr.f32.gmra.mrb[12].mxu0 %v382_v15  ;;  %2020 = vmatprep.subr.bf16.mxu1 %v2019_v12  ;;  %v357_v55 = vld [vmem:[%s3107_s2 + $0x58] sm:$0xff]  ;;  %v962_v61 = vld [vmem:[%s2452_s10 + $0x1a0] sm:$0xff]  ;;  %v963_v62 = vld [vmem:[%s2452_s10 + $0x1a8] sm:$0xff]  ;;  %v2033_v0 = vpack.c.bf16 %v945_v54, %v944_v53  ;;  %p2160_p0 = pneg %p2159_p13 }
  0x59   : > { %1990 = vmatpush3.bf16.msra.mxu0 %v1989_v16  ;;  %637 = vmatprep.mubr.f32.mxu0 %v389_v23  ;;  %v977_v58 = vld [vmem:[%s2452_s10 + $0x218] sm:$0xff]  ;;  %v356_v63 = vld [vmem:[%s3107_s2 + $0x50] sm:$0xff]  ;;  %v994_v1 = vld [vmem:[%s2452_s10 + $0x2a0] sm:$0xff]  ;;  %v2035_v8 = vpack.c.bf16 %v963_v62, %v962_v61 }
  0x5a   : > { %738 = vmatmul.mubr.f32.gmra.mrb[12].mxu1 %v384_v19  ;;  %1992 = vmatprep.subr.bf16.mxu0 %v1991_v24  ;;  %v869_v59 = vld [vmem:[%s3108_s3 + $0x38] sm:$0xff]  ;;  %v995_v2 = vld [vmem:[%s2452_s10 + $0x2a8] sm:$0xff]  ;;  %v868_v3 = vld [vmem:[%s3108_s3 + $0x30] sm:$0xff]  ;;  %v2065_v4 = vpack.c.bf16 %v977_v58, %v976_v57  ;;  %p2167_p5 = pnand %p2166_p3, %p2160_p0 }
  0x5b   : > { %2022 = vmatpush3.bf16.msra.mxu1 %v2021_v20  ;;  %742 = vmatprep.mubr.f32.mxu1 %v391_v27  ;;  %v946_v5 = vld [vmem:[%s2452_s10 + $0x120] sm:$0xff]  ;;  %v947_v6 = vld [vmem:[%s2452_s10 + $0x128] sm:$0xff]  ;;  %v2067_v12 = vpack.c.bf16 %v995_v2, %v994_v1  ;;  %v964_v13 = vld [vmem:[%s2452_s10 + $0x1b0] sm:$0xff] }
  0x5c   : > { %638 = vmatmul.mubr.f32.gmra.mrb[14].mxu0 %v388_v31  ;;  %2024 = vmatprep.subr.bf16.mxu1 %v2023_v28  ;;  %v363_v7 = vld [vmem:[%s3107_s2 + $0x88] sm:$0xff]  ;;  %v978_v9 = vld [vmem:[%s2452_s10 + $0x220] sm:$0xff]  ;;  %v965_v14 = vld [vmem:[%s2452_s10 + $0x1b8] sm:$0xff]  ;;  %v2037_v16 = vpack.c.bf16 %v947_v6, %v946_v5 }
  0x5d   : > { %1994 = vmatpush3.bf16.msra.mxu0 %v1993_v32  ;;  %812 = vmatprep.mubr.f32.mxu0 %v351_v39  ;;  %v979_v10 = vld [vmem:[%s2452_s10 + $0x228] sm:$0xff]  ;;  %v362_v15 = vld [vmem:[%s3107_s2 + $0x80] sm:$0xff]  ;;  %v996_v17 = vld [vmem:[%s2452_s10 + $0x2b0] sm:$0xff]  ;;  %v2039_v24 = vpack.c.bf16 %v965_v14, %v964_v13 }
  0x5e   : > { %743 = vmatmul.mubr.f32.gmra.mrb[14].mxu1 %v390_v35  ;;  %2028 = vmatprep.subr.bf16.mxu0 %v2027_v40  ;;  %v875_v11 = vld [vmem:[%s3108_s3 + $0x68] sm:$0xff]  ;;  %v997_v18 = vld [vmem:[%s2452_s10 + $0x2b8] sm:$0xff]  ;;  %v874_v19 = vld [vmem:[%s3108_s3 + $0x60] sm:$0xff]  ;;  %v2069_v20 = vpack.c.bf16 %v979_v10, %v978_v9 }
  0x5f   : > { %2026 = vmatpush3.bf16.msra.mxu1 %v2025_v36  ;;  %1118 = vmatprep.mubr.f32.mxu1 %v863_v43  ;;  %v948_v21 = vld [vmem:[%s2452_s10 + $0x130] sm:$0xff]  ;;  %v949_v22 = vld [vmem:[%s2452_s10 + $0x138] sm:$0xff]  ;;  %v2071_v28 = vpack.c.bf16 %v997_v18, %v996_v17  ;;  %v966_v29 = vld [vmem:[%s2452_s10 + $0x1c0] sm:$0xff] }
  0x60   : > { %813 = vmatmul.mubr.f32.vlgmr.msra.gmra.mrb[16].mxu0 %v350_v47  ;;  %2060 = vmatprep.subr.bf16.mxu1 %v2059_v44  ;;  %v369_v23 = vld [vmem:[%s3107_s2 + $0xb8] sm:$0xff]  ;;  %v980_v25 = vld [vmem:[%s2452_s10 + $0x230] sm:$0xff]  ;;  %v967_v30 = vld [vmem:[%s2452_s10 + $0x1c8] sm:$0xff]  ;;  %v2041_v32 = vpack.c.bf16 %v949_v22, %v948_v21 }
  0x61   : > { %2030 = vmatpush3.bf16.msra.mxu0 %v2029_v48  ;;  %817 = vmatprep.mubr.f32.mxu0 %v357_v55  ;;  %v981_v26 = vld [vmem:[%s2452_s10 + $0x238] sm:$0xff]  ;;  %v368_v31 = vld [vmem:[%s3107_s2 + $0xb0] sm:$0xff]  ;;  %v998_v33 = vld [vmem:[%s2452_s10 + $0x2c0] sm:$0xff]  ;;  %v2043_v40 = vpack.c.bf16 %v967_v30, %v966_v29 }
  0x62   : > { %1119 = vmatmul.mubr.f32.vlgmr.msra.gmra.mrb[16].mxu1 %v862_v51  ;;  %2032 = vmatprep.subr.bf16.mxu0 %v2031_v56  ;;  %v881_v27 = vld [vmem:[%s3108_s3 + $0x98] sm:$0xff]  ;;  %v999_v34 = vld [vmem:[%s2452_s10 + $0x2c8] sm:$0xff]  ;;  %v880_v35 = vld [vmem:[%s3108_s3 + $0x90] sm:$0xff]  ;;  %v2073_v36 = vpack.c.bf16 %v981_v26, %v980_v25 }
  0x63   : > { %2062 = vmatpush3.bf16.msra.mxu1 %v2061_v52  ;;  %1123 = vmatprep.mubr.f32.mxu1 %v869_v59  ;;  %v950_v37 = vld [vmem:[%s2452_s10 + $0x140] sm:$0xff]  ;;  %v951_v38 = vld [vmem:[%s2452_s10 + $0x148] sm:$0xff]  ;;  %v2075_v44 = vpack.c.bf16 %v999_v34, %v998_v33  ;;  %v968_v45 = vld [vmem:[%s2452_s10 + $0x1d0] sm:$0xff] }
  0x64   : > { %818 = vmatmul.mubr.f32.gmra.mrb[18].mxu0 %v356_v63  ;;  %2064 = vmatprep.subr.bf16.mxu1 %v2063_v60  ;;  %v375_v39 = vld [vmem:[%s3107_s2 + $0xe8] sm:$0xff]  ;;  %v982_v41 = vld [vmem:[%s2452_s10 + $0x240] sm:$0xff]  ;;  %v969_v46 = vld [vmem:[%s2452_s10 + $0x1d8] sm:$0xff]  ;;  %v2045_v48 = vpack.c.bf16 %v951_v38, %v950_v37 }
  0x65   : > { %2034 = vmatpush3.bf16.msra.mxu0 %v2033_v0  ;;  %822 = vmatprep.mubr.f32.mxu0 %v363_v7  ;;  %v983_v42 = vld [vmem:[%s2452_s10 + $0x248] sm:$0xff]  ;;  %v374_v47 = vld [vmem:[%s3107_s2 + $0xe0] sm:$0xff]  ;;  %v1000_v49 = vld [vmem:[%s2452_s10 + $0x2d0] sm:$0xff]  ;;  %v2047_v56 = vpack.c.bf16 %v969_v46, %v968_v45 }
  0x66   : > { %1124 = vmatmul.mubr.f32.gmra.mrb[18].mxu1 %v868_v3  ;;  %2036 = vmatprep.subr.bf16.mxu0 %v2035_v8  ;;  %v887_v43 = vld [vmem:[%s3108_s3 + $0xc8] sm:$0xff]  ;;  %v1001_v50 = vld [vmem:[%s2452_s10 + $0x2d8] sm:$0xff]  ;;  %v886_v51 = vld [vmem:[%s3108_s3 + $0xc0] sm:$0xff]  ;;  %v2077_v52 = vpack.c.bf16 %v983_v42, %v982_v41 }
  0x67   : > { %2066 = vmatpush3.bf16.msra.mxu1 %v2065_v4  ;;  %1128 = vmatprep.mubr.f32.mxu1 %v875_v11  ;;  %v952_v53 = vld [vmem:[%s2452_s10 + $0x150] sm:$0xff]  ;;  %v953_v54 = vld [vmem:[%s2452_s10 + $0x158] sm:$0xff]  ;;  %v2079_v60 = vpack.c.bf16 %v1001_v50, %v1000_v49  ;;  %v970_v61 = vld [vmem:[%s2452_s10 + $0x1e0] sm:$0xff] }
  0x68   : > { %823 = vmatmul.mubr.f32.gmra.mrb[20].mxu0 %v362_v15  ;;  %2068 = vmatprep.subr.bf16.mxu1 %v2067_v12  ;;  %v381_v55 = vld [vmem:[%s3107_s2 + $0x118] sm:$0xff]  ;;  %v984_v57 = vld [vmem:[%s2452_s10 + $0x250] sm:$0xff]  ;;  %v971_v62 = vld [vmem:[%s2452_s10 + $0x1e8] sm:$0xff]  ;;  %v2049_v0 = vpack.c.bf16 %v953_v54, %v952_v53 }
  0x69   : > { %2038 = vmatpush3.bf16.msra.mxu0 %v2037_v16  ;;  %827 = vmatprep.mubr.f32.mxu0 %v369_v23  ;;  %v985_v58 = vld [vmem:[%s2452_s10 + $0x258] sm:$0xff]  ;;  %v380_v63 = vld [vmem:[%s3107_s2 + $0x110] sm:$0xff]  ;;  %v1002_v1 = vld [vmem:[%s2452_s10 + $0x2e0] sm:$0xff]  ;;  %v2051_v8 = vpack.c.bf16 %v971_v62, %v970_v61 }
  0x6a   : > { %1129 = vmatmul.mubr.f32.gmra.mrb[20].mxu1 %v874_v19  ;;  %2040 = vmatprep.subr.bf16.mxu0 %v2039_v24  ;;  %v893_v59 = vld [vmem:[%s3108_s3 + $0xf8] sm:$0xff]  ;;  %v1003_v2 = vld [vmem:[%s2452_s10 + $0x2e8] sm:$0xff]  ;;  %v892_v3 = vld [vmem:[%s3108_s3 + $0xf0] sm:$0xff]  ;;  %v2081_v4 = vpack.c.bf16 %v985_v58, %v984_v57 }
  0x6b   : > { %2070 = vmatpush3.bf16.msra.mxu1 %v2069_v20  ;;  %1133 = vmatprep.mubr.f32.mxu1 %v881_v27  ;;  %v954_v5 = vld [vmem:[%s2452_s10 + $0x160] sm:$0xff]  ;;  %v955_v6 = vld [vmem:[%s2452_s10 + $0x168] sm:$0xff]  ;;  %v2083_v12 = vpack.c.bf16 %v1003_v2, %v1002_v1  ;;  %v972_v13 = vld [vmem:[%s2452_s10 + $0x1f0] sm:$0xff] }
  0x6c   : > { %828 = vmatmul.mubr.f32.gmra.mrb[22].mxu0 %v368_v31  ;;  %2072 = vmatprep.subr.bf16.mxu1 %v2071_v28  ;;  %v387_v7 = vld [vmem:[%s3107_s2 + $0x148] sm:$0xff]  ;;  %v986_v9 = vld [vmem:[%s2452_s10 + $0x260] sm:$0xff]  ;;  %v973_v14 = vld [vmem:[%s2452_s10 + $0x1f8] sm:$0xff]  ;;  %v2053_v16 = vpack.c.bf16 %v955_v6, %v954_v5 }
  0x6d   : > { %2042 = vmatpush3.bf16.msra.mxu0 %v2041_v32  ;;  %832 = vmatprep.mubr.f32.mxu0 %v375_v39  ;;  %v987_v10 = vld [vmem:[%s2452_s10 + $0x268] sm:$0xff]  ;;  %v386_v15 = vld [vmem:[%s3107_s2 + $0x140] sm:$0xff]  ;;  %v1004_v17 = vld [vmem:[%s2452_s10 + $0x2f0] sm:$0xff]  ;;  %v2055_v24 = vpack.c.bf16 %v973_v14, %v972_v13 }
  0x6e   : > { %1134 = vmatmul.mubr.f32.gmra.mrb[22].mxu1 %v880_v35  ;;  %2044 = vmatprep.subr.bf16.mxu0 %v2043_v40  ;;  %v899_v11 = vld [vmem:[%s3108_s3 + $0x128] sm:$0xff]  ;;  %v1005_v18 = vld [vmem:[%s2452_s10 + $0x2f8] sm:$0xff]  ;;  %v898_v19 = vld [vmem:[%s3108_s3 + $0x120] sm:$0xff]  ;;  %v2085_v20 = vpack.c.bf16 %v987_v10, %v986_v9 }
  0x6f   : > { %2074 = vmatpush3.bf16.msra.mxu1 %v2073_v36  ;;  %1138 = vmatprep.mubr.f32.mxu1 %v887_v43  ;;  %v956_v21 = vld [vmem:[%s2452_s10 + $0x170] sm:$0xff]  ;;  %v957_v22 = vld [vmem:[%s2452_s10 + $0x178] sm:$0xff]  ;;  %v2087_v28 = vpack.c.bf16 %v1005_v18, %v1004_v17  ;;  %v867_v34 = vld [vmem:[%s3108_s3 + $0x28] sm:$0xff] }
  0x70   : > { %833 = vmatmul.mubr.f32.gmra.mrb[24].mxu0 %v374_v47  ;;  %2076 = vmatprep.subr.bf16.mxu1 %v2075_v44  ;;  %v393_v23 = vld [vmem:[%s3107_s2 + $0x178] sm:$0xff]  ;;  %v988_v25 = vld [vmem:[%s2452_s10 + $0x270] sm:$0xff]  ;;  %v2057_v30 = vpack.c.bf16 %v957_v22, %v956_v21  ;;  %v490_v35 = vld [vmem:[%s3109_s4] sm:$0xff] }
  0x71   : > { %2046 = vmatpush3.bf16.msra.mxu0 %v2045_v48  ;;  %837 = vmatprep.mubr.f32.mxu0 %v381_v55  ;;  %v989_v26 = vld [vmem:[%s2452_s10 + $0x278] sm:$0xff]  ;;  %v392_v29 = vld [vmem:[%s3107_s2 + $0x170] sm:$0xff]  ;;  %v866_v38 = vld [vmem:[%s3108_s3 + $0x20] sm:$0xff]  ;;  %s1378_s10 = scalar_lea.sflag [#allocation3], %s2929_s23 }
  0x72   : > { %1139 = vmatmul.mubr.f32.gmra.mrb[24].mxu1 %v886_v51  ;;  %2048 = vmatprep.subr.bf16.mxu0 %v2047_v56  ;;  %v905_v27 = vld [vmem:[%s3108_s3 + $0x158] sm:$0xff]  ;;  %v904_v31 = vld [vmem:[%s3108_s3 + $0x150] sm:$0xff]  ;;  %v2089_v32 = vpack.c.bf16 %v989_v26, %v988_v25  ;;  %v871_v39 = vld [vmem:[%s3108_s3 + $0x48] sm:$0xff] }
  0x73   : > { %2078 = vmatpush3.bf16.msra.mxu1 %v2077_v52  ;;  %1143 = vmatprep.mubr.f32.mxu1 %v893_v59  ;;  %v865_v33 = vld [vmem:[%s3108_s3 + $0x18] sm:$0xff]  ;;  %v864_v36 = vld [vmem:[%s3108_s3 + $0x10] sm:$0xff]  ;;  %v491_v41 = vld [vmem:[%s3109_s4 + $0x8] sm:$0xff] }
  0x74   : > { %838 = vmatmul.mubr.f32.gmra.mrb[26].mxu0 %v380_v63  ;;  %2080 = vmatprep.subr.bf16.mxu1 %v2079_v60  ;;  %v492_v37 = vld [vmem:[%s3109_s4 + $0x10] sm:$0xff]  ;;  %v873_v40 = vld [vmem:[%s3108_s3 + $0x58] sm:$0xff]  ;;  %v870_v42 = vld [vmem:[%s3108_s3 + $0x40] sm:$0xff] }
  0x75   : > { %2050 = vmatpush3.bf16.msra.mxu0 %v2049_v0  ;;  %842 = vmatprep.mubr.f32.mxu0 %v387_v7  ;;  %v493_v43 = vld [vmem:[%s3109_s4 + $0x18] sm:$0xff]  ;;  %v872_v44 = vld [vmem:[%s3108_s3 + $0x50] sm:$0xff]  ;;  %v879_v46 = vld [vmem:[%s3108_s3 + $0x88] sm:$0xff] }
  0x76   : > { %1144 = vmatmul.mubr.f32.gmra.mrb[26].mxu1 %v892_v3  ;;  %2052 = vmatprep.subr.bf16.mxu0 %v2051_v8  ;;  %v877_v45 = vld [vmem:[%s3108_s3 + $0x78] sm:$0xff]  ;;  %v494_v47 = vld [vmem:[%s3109_s4 + $0x20] sm:$0xff]  ;;  %v876_v48 = vld [vmem:[%s3108_s3 + $0x70] sm:$0xff] }
  0x77   : > { %2082 = vmatpush3.bf16.msra.mxu1 %v2081_v4  ;;  %1148 = vmatprep.mubr.f32.mxu1 %v899_v11  ;;  %v495_v49 = vld [vmem:[%s3109_s4 + $0x28] sm:$0xff]  ;;  %v878_v50 = vld [vmem:[%s3108_s3 + $0x80] sm:$0xff]  ;;  %v885_v52 = vld [vmem:[%s3108_s3 + $0xb8] sm:$0xff] }
  0x78   : > { %843 = vmatmul.mubr.f32.gmra.mrb[28].mxu0 %v386_v15  ;;  %2084 = vmatprep.subr.bf16.mxu1 %v2083_v12  ;;  %v883_v51 = vld [vmem:[%s3108_s3 + $0xa8] sm:$0xff]  ;;  %v496_v53 = vld [vmem:[%s3109_s4 + $0x30] sm:$0xff]  ;;  %v882_v54 = vld [vmem:[%s3108_s3 + $0xa0] sm:$0xff] }
  0x79   : > { %2054 = vmatpush3.bf16.msra.mxu0 %v2053_v16  ;;  %847 = vmatprep.mubr.f32.mxu0 %v393_v23  ;;  %v497_v55 = vld [vmem:[%s3109_s4 + $0x38] sm:$0xff]  ;;  %v884_v56 = vld [vmem:[%s3108_s3 + $0xb0] sm:$0xff]  ;;  %v891_v58 = vld [vmem:[%s3108_s3 + $0xe8] sm:$0xff] }
  0x7a   : > { %1149 = vmatmul.mubr.f32.gmra.mrb[28].mxu1 %v898_v19  ;;  %2056 = vmatprep.subr.bf16.mxu0 %v2055_v24  ;;  %v889_v57 = vld [vmem:[%s3108_s3 + $0xd8] sm:$0xff]  ;;  %v1006_v59 = vld [vmem:[%s3110_s5] sm:$0xff]  ;;  %v888_v60 = vld [vmem:[%s3108_s3 + $0xd0] sm:$0xff] }
  0x7b   : > { %2086 = vmatpush3.bf16.msra.mxu1 %v2085_v20  ;;  %1153 = vmatprep.mubr.f32.mxu1 %v905_v27  ;;  %v1007_v61 = vld [vmem:[%s3110_s5 + $0x8] sm:$0xff]  ;;  %v890_v62 = vld [vmem:[%s3108_s3 + $0xe0] sm:$0xff]  ;;  %v897_v0 = vld [vmem:[%s3108_s3 + $0x118] sm:$0xff] }
  0x7c   : > { %848 = vmatmul.mubr.f32.gmra.mrb[30].mxu0 %v392_v29  ;;  %2088 = vmatprep.subr.bf16.mxu1 %v2087_v28  ;;  %v895_v63 = vld [vmem:[%s3108_s3 + $0x108] sm:$0xff]  ;;  %v1008_v1 = vld [vmem:[%s3110_s5 + $0x10] sm:$0xff]  ;;  %v894_v2 = vld [vmem:[%s3108_s3 + $0x100] sm:$0xff] }
  0x7d   : > { %2058 = vmatpush3.bf16.msra.mxu0 %v2057_v30  ;;  %1223 = vmatprep.mubr.f32.mxu0 %v865_v33  ;;  %v1009_v3 = vld [vmem:[%s3110_s5 + $0x18] sm:$0xff]  ;;  %v896_v4 = vld [vmem:[%s3108_s3 + $0x110] sm:$0xff]  ;;  %v903_v6 = vld [vmem:[%s3108_s3 + $0x148] sm:$0xff] }
  0x7e   : > { %1154 = vmatmul.mubr.f32.gmra.mrb[30].mxu1 %v904_v31  ;;  %500 = vperm.xlu0 %2155, %v490_v35   ;;  %v901_v5 = vld [vmem:[%s3108_s3 + $0x138] sm:$0xff]  ;;  %v1010_v7 = vld [vmem:[%s3110_s5 + $0x20] sm:$0xff]  ;;  %v900_v8 = vld [vmem:[%s3108_s3 + $0x130] sm:$0xff] }
  0x7f   : > { %2090 = vmatpush3.bf16.msra.mxu1 %v2089_v32  ;;  %1328 = vmatprep.mubr.f32.mxu1 %v867_v34  ;;  %v1011_v9 = vld [vmem:[%s3110_s5 + $0x28] sm:$0xff]  ;;  %v902_v10 = vld [vmem:[%s3108_s3 + $0x140] sm:$0xff]  ;;  %v909_v12 = vld [vmem:[%s3108_s3 + $0x178] sm:$0xff] }
  0x80   : > { %1224 = vmatmul.mubr.f32.vlgmr.msra.gmra.mrb[32].mxu0 %v864_v36  ;;  %510 = vperm.xlu1 %2156, %v492_v37   ;;  %v907_v11 = vld [vmem:[%s3108_s3 + $0x168] sm:$0xff]  ;;  %v1012_v13 = vld [vmem:[%s3110_s5 + $0x30] sm:$0xff]  ;;  %v906_v14 = vld [vmem:[%s3108_s3 + $0x160] sm:$0xff] }
  0x81   : > { %1228 = vmatprep.mubr.f32.mxu0 %v871_v39  ;;  %v1013_v15 = vld [vmem:[%s3110_s5 + $0x38] sm:$0xff]  ;;  %v908_v16 = vld [vmem:[%s3108_s3 + $0x170] sm:$0xff] }
  0x82   : > { %1329 = vmatmul.mubr.f32.vlgmr.msra.gmra.mrb[32].mxu1 %v866_v38  ;;  %505 = vperm.xlu0 %2155, %v491_v41  }
  0x83   : > { %1333 = vmatprep.mubr.f32.mxu1 %v873_v40 }
  0x84   : > { %1229 = vmatmul.mubr.f32.gmra.mrb[34].mxu0 %v870_v42  ;;  %515 = vperm.xlu1 %2156, %v493_v43  }
  0x85   : > { %1233 = vmatprep.mubr.f32.mxu0 %v877_v45 }
  0x86   : > { %1334 = vmatmul.mubr.f32.gmra.mrb[34].mxu1 %v872_v44  ;;  %520 = vperm.xlu0 %2155, %v494_v47  }
  0x87   : > { %1338 = vmatprep.mubr.f32.mxu1 %v879_v46 }
  0x88   : > { %1234 = vmatmul.mubr.f32.gmra.mrb[36].mxu0 %v876_v48  ;;  %525 = vperm.xlu1 %2156, %v495_v49  }
  0x89   : > { %1238 = vmatprep.mubr.f32.mxu0 %v883_v51 }
  0x8a   : > { %1339 = vmatmul.mubr.f32.gmra.mrb[36].mxu1 %v878_v50  ;;  %530 = vperm.xlu0 %2155, %v496_v53  }
  0x8b   : > { %1343 = vmatprep.mubr.f32.mxu1 %v885_v52 }
  0x8c   : > { %1239 = vmatmul.mubr.f32.gmra.mrb[38].mxu0 %v882_v54  ;;  %535 = vperm.xlu1 %2156, %v497_v55  }
  0x8d   : > { %1243 = vmatprep.mubr.f32.mxu0 %v889_v57 }
  0x8e   : > { %1344 = vmatmul.mubr.f32.gmra.mrb[38].mxu1 %v884_v56  ;;  %1016 = vperm.xlu0 %2155, %v1006_v59  }
  0x8f   : > { %1348 = vmatprep.mubr.f32.mxu1 %v891_v58 }
  0x90   : > { %1244 = vmatmul.mubr.f32.gmra.mrb[40].mxu0 %v888_v60  ;;  %1021 = vperm.xlu1 %2156, %v1007_v61  }
  0x91   : > { %1248 = vmatprep.mubr.f32.mxu0 %v895_v63 }
  0x92   : > { %1349 = vmatmul.mubr.f32.gmra.mrb[40].mxu1 %v890_v62  ;;  %1026 = vperm.xlu0 %2155, %v1008_v1  }
  0x93   : > { %1353 = vmatprep.mubr.f32.mxu1 %v897_v0 }
  0x94   : > { %1249 = vmatmul.mubr.f32.gmra.mrb[42].mxu0 %v894_v2  ;;  %1031 = vperm.xlu1 %2156, %v1009_v3  }
  0x95   : > { %1253 = vmatprep.mubr.f32.mxu0 %v901_v5 }
  0x96   : > { %1354 = vmatmul.mubr.f32.gmra.mrb[42].mxu1 %v896_v4  ;;  %1036 = vperm.xlu0 %2155, %v1010_v7  }
  0x97   : > { %1358 = vmatprep.mubr.f32.mxu1 %v903_v6 }
  0x98   : > { %1254 = vmatmul.mubr.f32.gmra.mrb[44].mxu0 %v900_v8  ;;  %1041 = vperm.xlu1 %2156, %v1011_v9  }
  0x99   : > { %1258 = vmatprep.mubr.f32.mxu0 %v907_v11 }
  0x9a   : > { %1359 = vmatmul.mubr.f32.gmra.mrb[44].mxu1 %v902_v10  ;;  %1046 = vperm.xlu0 %2155, %v1012_v13  }
  0x9b   : > { %1363 = vmatprep.mubr.f32.mxu1 %v909_v12 }
  0x9c   : > { %1259 = vmatmul.mubr.f32.gmra.mrb[46].mxu0 %v906_v14  ;;  %1051 = vperm.xlu1 %2156, %v1013_v15  }
  0x9e   : > { %1364 = vmatmul.mubr.f32.gmra.mrb[46].mxu1 %v908_v16 }
  0xfd   : > { %v501_v17 = vpop.permute.xlu0 %500 }
  0xff   : > { %v511_v32 = vpop.permute.xlu1 %510 }
 0x101   : > { %v506_v26 = vpop.permute.xlu0 %505 }
 0x103   : > { %v516_v44 = vpop.permute.xlu1 %515 }
 0x105   : > { %v521_v53 = vpop.permute.xlu0 %520 }
 0x107   : > { %v526_v62 = vpop.permute.xlu1 %525 }
 0x109   : > { %v531_v7 = vpop.permute.xlu0 %530 }
 0x10b   : > { %v536_v16 = vpop.permute.xlu1 %535 }
 0x113   : > { %v1595_v18 = vpop.f32.mrb[0].mxu0 }
 0x114   : > { %v1596_v19 = vpop.f32.mrb[1].mxu0 }
 0x115   : > { %v1651_v20 = vpop.f32.mrb[0].mxu1  ;;  %v1597_v21 = vadd.f32 %v1596_v19, %v1595_v18 }
 0x116   : > { %v1652_v22 = vpop.f32.mrb[1].mxu1 }
 0x117   : > { %v1653_v23 = vadd.f32 %v1652_v22, %v1651_v20  ;;  %v605_v24 = vadd.f32 %v1597_v21, %v501_v17  ;;  %v1598_v25 = vpop.f32.mrb[2].mxu0 }
 0x118   : > { %v1599_v27 = vpop.f32.mrb[3].mxu0 }
 0x119   : > { %v1654_v28 = vpop.f32.mrb[2].mxu1  ;;  %v2916_v29 = vadd.f32 %v1653_v23, %v605_v24  ;;  %v1600_v30 = vadd.f32 %v1599_v27, %v1598_v25 }
 0x11a   : > { %v1655_v31 = vpop.f32.mrb[3].mxu1 }
 0x11b   : > { %v1656_v33 = vadd.f32 %v1655_v31, %v1654_v28  ;;  %v610_v34 = vadd.f32 %v1600_v30, %v506_v26  ;;  %v1601_v35 = vpop.f32.mrb[4].mxu0 }
 0x11c   : > { %v1602_v36 = vpop.f32.mrb[5].mxu0 }
 0x11d   : > { %v1657_v37 = vpop.f32.mrb[4].mxu1  ;;  %v2918_v38 = vadd.f32 %v1656_v33, %v610_v34  ;;  %v1603_v39 = vadd.f32 %v1602_v36, %v1601_v35 }
 0x11e   : > { %v1658_v40 = vpop.f32.mrb[5].mxu1 }
 0x11f   : > { %v1659_v41 = vadd.f32 %v1658_v40, %v1657_v37  ;;  %v615_v42 = vadd.f32 %v1603_v39, %v511_v32  ;;  %v1604_v43 = vpop.f32.mrb[6].mxu0 }
 0x120   : > { %v1605_v45 = vpop.f32.mrb[7].mxu0 }
 0x121   : > { %v1660_v46 = vpop.f32.mrb[6].mxu1  ;;  %v2920_v47 = vadd.f32 %v1659_v41, %v615_v42  ;;  %v1606_v48 = vadd.f32 %v1605_v45, %v1604_v43 }
 0x122   : > { %v1661_v49 = vpop.f32.mrb[7].mxu1 }
 0x123   : > { %v1662_v50 = vadd.f32 %v1661_v49, %v1660_v46  ;;  %v620_v51 = vadd.f32 %v1606_v48, %v516_v44  ;;  %v1607_v52 = vpop.f32.mrb[8].mxu0 }
 0x124   : > { %v1608_v54 = vpop.f32.mrb[9].mxu0 }
 0x125   : > { %v1663_v55 = vpop.f32.mrb[8].mxu1  ;;  %v2922_v56 = vadd.f32 %v1662_v50, %v620_v51  ;;  %v1609_v57 = vadd.f32 %v1608_v54, %v1607_v52 }
 0x126   : > { %v1664_v58 = vpop.f32.mrb[9].mxu1 }
 0x127   : > { %v1665_v59 = vadd.f32 %v1664_v58, %v1663_v55  ;;  %v625_v60 = vadd.f32 %v1609_v57, %v521_v53  ;;  %v1610_v61 = vpop.f32.mrb[10].mxu0 }
 0x128   : > { %v1611_v63 = vpop.f32.mrb[11].mxu0 }
 0x129   : > { %v1666_v0 = vpop.f32.mrb[10].mxu1  ;;  %v2924_v1 = vadd.f32 %v1665_v59, %v625_v60  ;;  %v1612_v2 = vadd.f32 %v1611_v63, %v1610_v61 }
 0x12a   : > { %v1667_v3 = vpop.f32.mrb[11].mxu1 }
 0x12b   : > { %v1668_v4 = vadd.f32 %v1667_v3, %v1666_v0  ;;  %v630_v5 = vadd.f32 %v1612_v2, %v526_v62  ;;  %v1613_v6 = vpop.f32.mrb[12].mxu0 }
 0x12c   : > { %v1614_v8 = vpop.f32.mrb[13].mxu0 }
 0x12d   : > { %v1669_v9 = vpop.f32.mrb[12].mxu1  ;;  %v2926_v10 = vadd.f32 %v1668_v4, %v630_v5  ;;  %v1615_v11 = vadd.f32 %v1614_v8, %v1613_v6 }
 0x12e   : > { %v1670_v12 = vpop.f32.mrb[13].mxu1 }
 0x12f   : > { %v1671_v13 = vadd.f32 %v1670_v12, %v1669_v9  ;;  %v635_v14 = vadd.f32 %v1615_v11, %v531_v7  ;;  %v1616_v15 = vpop.f32.mrb[14].mxu0 }
 0x130   : > { %v1617_v17 = vpop.f32.mrb[15].mxu0 }
 0x131   : > { %v1672_v18 = vpop.f32.mrb[14].mxu1  ;;  %v2931_v19 = vadd.f32 %v1671_v13, %v635_v14  ;;  %v1618_v20 = vadd.f32 %v1617_v17, %v1616_v15  ;;  %v1017_v15 = vpop.permute.xlu0 %1016 }
 0x132   : > { %v1673_v21 = vpop.f32.mrb[15].mxu1 }
 0x133   : > { %v1674_v22 = vadd.f32 %v1673_v21, %v1672_v18  ;;  %v640_v23 = vadd.f32 %v1618_v20, %v536_v16  ;;  %v1707_v24 = vpop.f32.mrb[16].mxu0 }
 0x134   : > { %v1708_v25 = vpop.f32.mrb[17].mxu0 }
 0x135   : > { %v1763_v26 = vpop.f32.mrb[16].mxu1  ;;  %v2934_v27 = vadd.f32 %v1674_v22, %v640_v23  ;;  %v1709_v28 = vadd.f32 %v1708_v25, %v1707_v24  ;;  %v1022_v24 = vpop.permute.xlu1 %1021 }
 0x136   : > { %v1764_v30 = vpop.f32.mrb[17].mxu1 }
 0x137   : > { %v2936_v31 = vadd.f32 %v1764_v30, %v1763_v26  ;;  %v815_v32 = vadd.f32 %v1709_v28, %v2916_v29  ;;  %v1710_v33 = vpop.f32.mrb[18].mxu0 }
 0x138   : > { %v1711_v34 = vpop.f32.mrb[19].mxu0 }
 0x139   : > { %v1766_v35 = vpop.f32.mrb[18].mxu1  ;;  %854 = vst.msk [vmem:[%s2941_s16] sm:$0xff] %vm853_vm0, %v815_v32  ;;  %v1712_v36 = vadd.f32 %v1711_v34, %v1710_v33  ;;  %v1121_v21 = vadd.f32 %v2936_v31, %v1017_v15 }
 0x13a   : > { %v1767_v37 = vpop.f32.mrb[19].mxu1 }
 0x13b   : > { %v2945_v39 = vadd.f32 %v1767_v37, %v1766_v35  ;;  %v820_v40 = vadd.f32 %v1712_v36, %v2918_v38  ;;  %v1713_v41 = vpop.f32.mrb[20].mxu0 }
 0x13c   : > { %v1714_v42 = vpop.f32.mrb[21].mxu0 }
 0x13d   : > { %v1769_v29 = vpop.f32.mrb[20].mxu1  ;;  %855 = vst.msk [vmem:[%s2941_s16 + $0x8] sm:$0xff] %vm853_vm0, %v820_v40  ;;  %v1715_v43 = vadd.f32 %v1714_v42, %v1713_v41 }
 0x13e   : > { %v1770_v44 = vpop.f32.mrb[21].mxu1 }
 0x13f   : > { %v2950_v45 = vadd.f32 %v1770_v44, %v1769_v29  ;;  %v825_v46 = vadd.f32 %v1715_v43, %v2920_v47  ;;  %v1716_v48 = vpop.f32.mrb[22].mxu0 }
 0x140   : > { %v1717_v49 = vpop.f32.mrb[23].mxu0 }
 0x141   : > { %v1772_v50 = vpop.f32.mrb[22].mxu1  ;;  %856 = vst.msk [vmem:[%s2941_s16 + $0x10] sm:$0xff] %vm853_vm0, %v825_v46  ;;  %v1718_v51 = vadd.f32 %v1717_v49, %v1716_v48 }
 0x142   : > { %v1773_v38 = vpop.f32.mrb[23].mxu1 }
 0x143   : > { %v2955_v52 = vadd.f32 %v1773_v38, %v1772_v50  ;;  %v830_v53 = vadd.f32 %v1718_v51, %v2922_v56  ;;  %v1719_v54 = vpop.f32.mrb[24].mxu0 }
 0x144   : > { %v1720_v55 = vpop.f32.mrb[25].mxu0 }
 0x145   : > { %v1775_v57 = vpop.f32.mrb[24].mxu1  ;;  %857 = vst.msk [vmem:[%s2941_s16 + $0x18] sm:$0xff] %vm853_vm0, %v830_v53  ;;  %v1721_v58 = vadd.f32 %v1720_v55, %v1719_v54 }
 0x146   : > { %v1776_v47 = vpop.f32.mrb[25].mxu1 }
 0x147   : > { %v2960_v59 = vadd.f32 %v1776_v47, %v1775_v57  ;;  %v835_v60 = vadd.f32 %v1721_v58, %v2924_v1  ;;  %v1722_v61 = vpop.f32.mrb[26].mxu0 }
 0x148   : > { %v1723_v62 = vpop.f32.mrb[27].mxu0 }
 0x149   : > { %v1778_v63 = vpop.f32.mrb[26].mxu1  ;;  %858 = vst.msk [vmem:[%s2941_s16 + $0x20] sm:$0xff] %vm853_vm0, %v835_v60  ;;  %v1724_v56 = vadd.f32 %v1723_v62, %v1722_v61 }
 0x14a   : > { %v1779_v0 = vpop.f32.mrb[27].mxu1 }
 0x14b   : > { %v2965_v2 = vadd.f32 %v1779_v0, %v1778_v63  ;;  %v840_v3 = vadd.f32 %v1724_v56, %v2926_v10  ;;  %v1725_v4 = vpop.f32.mrb[28].mxu0 }
 0x14c   : > { %v1726_v5 = vpop.f32.mrb[29].mxu0 }
 0x14d   : > { %v1781_v6 = vpop.f32.mrb[28].mxu1  ;;  %859 = vst.msk [vmem:[%s2941_s16 + $0x28] sm:$0xff] %vm853_vm0, %v840_v3  ;;  %v1727_v1 = vadd.f32 %v1726_v5, %v1725_v4 }
 0x14e   : > { %v1782_v7 = vpop.f32.mrb[29].mxu1 }
 0x14f   : > { %v2970_v8 = vadd.f32 %v1782_v7, %v1781_v6  ;;  %v845_v9 = vadd.f32 %v1727_v1, %v2931_v19  ;;  %v1728_v11 = vpop.f32.mrb[30].mxu0 }
 0x150   : > { %v1729_v12 = vpop.f32.mrb[31].mxu0 }
 0x151   : > { %v1784_v13 = vpop.f32.mrb[30].mxu1  ;;  %860 = vst.msk [vmem:[%s2941_s16 + $0x30] sm:$0xff] %vm853_vm0, %v845_v9  ;;  %v1730_v10 = vadd.f32 %v1729_v12, %v1728_v11 }
 0x152   : > { %v1785_v14 = vpop.f32.mrb[31].mxu1 }
 0x153   : > { %v2977_v16 = vadd.f32 %v1785_v14, %v1784_v13  ;;  %v850_v17 = vadd.f32 %v1730_v10, %v2934_v27  ;;  %v1819_v18 = vpop.f32.mrb[32].mxu0 }
 0x154   : > { %v1820_v19 = vpop.f32.mrb[33].mxu0 }
 0x155   : > { %v1875_v20 = vpop.f32.mrb[32].mxu1  ;;  %861 = vst.msk [vmem:[%s2941_s16 + $0x38] sm:$0xff] %vm853_vm0, %v850_v17  ;;  %v1821_v22 = vadd.f32 %v1820_v19, %v1819_v18 }
 0x156   : > { %v1876_v23 = vpop.f32.mrb[33].mxu1 }
 0x157   : > { %v1877_v25 = vadd.f32 %v1876_v23, %v1875_v20 }
 0x158   : > { %2170 = shalt.err (!%p2167_p5)
}
 0x159   : > { %s2171_s16 = scalar_lea.hbm %s2984_s21, 1024  ;;  %s2175_s30 = scalar_lea.hbm %s3111_s6, 2048 }
 0x15a   : > { %p2172_p6 = scmp.ne.s32.totalorder %s2984_s21, %s2171_s16  ;;  %p2176_p10 = scmp.lt.u32.totalorder %s2984_s21, %s3111_s6 }
 0x15b   : > { %p2177_p11 = scmp.lt.u32.totalorder %s2175_s30, %s2171_s16  ;;  %p2179_p13 = scmp.lt.u32.totalorder %s2171_s16, %s2984_s21 }
 0x15c   : > { %p2173_p7 = pnand %p2172_p6, %p2354_p4 }
 0x15d   : > { %p2178_p12 = por %p2177_p11, %p2176_p10 }
 0x15e   : > { %p2174_p9 = pneg %p2173_p7 }
 0x15f   : > { %p2180_p0 = por %p2179_p13, %p2178_p12 }
 0x161   : > { %p2181_p1 = pnand %p2180_p0, %p2174_p9 }
 0x163   : > { %2184 = shalt.err (!%p2181_p1)
}
 0x164   : > { %s2271_s22 = smov 128   ;;  %s2272_s12 = smov 8   ;;  %v1226_v26 = vadd.f32 %v1821_v22, %v1121_v21  ;;  %v1822_v27 = vpop.f32.mrb[34].mxu0  ;;  %v1878_v30 = vpop.f32.mrb[34].mxu1  ;;  %v1126_v31 = vadd.f32 %v2945_v39, %v1022_v24 }
 0x165   : > { %2092 = dma.vmem_to_hbm [thread:$0]  (%p2354_p4), %s2986_s18, 1024, %s2984_s21, %s1378_s10, %s2271_s22, %s2271_s22, %s2272_s12   ;;  %v1823_v28 = vpop.f32.mrb[35].mxu0  ;;  %v1879_v34 = vpop.f32.mrb[35].mxu1 }
 0x166   : > { %v1331_v32 = vadd.f32 %v1877_v25, %v1226_v26  ;;  %v1824_v33 = vadd.f32 %v1823_v28, %v1822_v27  ;;  %v1027_v35 = vpop.permute.xlu0 %1026  ;;  %v1880_v36 = vadd.f32 %v1879_v34, %v1878_v30  ;;  %s3022_s17 = scalar_lea.vmem [#allocation4], %s1549_s15  ;;  %v1825_v40 = vpop.f32.mrb[36].mxu0  ;;  %s3116_s18 = sshll.u32 %s2259_s27, 10 }
 0x167   : > { %v1826_v41 = vpop.f32.mrb[37].mxu0  ;;  %v1881_v42 = vpop.f32.mrb[36].mxu1  ;;  %v1131_v29 = vadd.f32 %v2950_v45, %v1027_v35  ;;  %s1414_s15 = sshll.u32 %s3022_s17, 4  ;;  %s3050_s16 = scalar_lea.hbm %s3112_s7, %s3116_s18  ;;  %s3052_s15 = int_to_ptr.vmem [resolvable:$true] %s1414_s15 }
 0x168   : > { %1369 = vst.msk [vmem:[%s3022_s17] sm:$0xff] %vm853_vm0, %v1331_v32  ;;  %v1231_v37 = vadd.f32 %v1824_v33, %v1126_v31  ;;  %v1827_v39 = vadd.f32 %v1826_v41, %v1825_v40  ;;  %v1882_v44 = vpop.f32.mrb[37].mxu1  ;;  %v1032_v46 = vpop.permute.xlu1 %1031  ;;  %s1383_s19 = scalar_lea.sflag [#allocation5], %s2929_s23  ;;  %s2185_s20 = scalar_lea.vmem %s3052_s15, 1024 }
 0x169   : > { %v1883_v48 = vadd.f32 %v1882_v44, %v1881_v42  ;;  %v1828_v50 = vpop.f32.mrb[38].mxu0  ;;  %v1884_v38 = vpop.f32.mrb[38].mxu1  ;;  %v1136_v53 = vadd.f32 %v2955_v52, %v1032_v46  ;;  %p2186_p2 = scmp.ne.s32.totalorder %s3052_s15, %s2185_s20  ;;  %s2273_s30 = smov [#allocation4]  }
 0x16a   : > { %v1336_v43 = vadd.f32 %v1880_v36, %v1231_v37  ;;  %v1236_v49 = vadd.f32 %v1827_v39, %v1131_v29  ;;  %v1829_v51 = vpop.f32.mrb[39].mxu0  ;;  %v1885_v57 = vpop.f32.mrb[39].mxu1  ;;  %s2189_s27 = sshll.u32 %s2273_s30, 4  ;;  %s2190_s27 = int_to_ptr.vmem [resolvable:$false] %s2189_s27 }
 0x16b   : > { %v1830_v55 = vadd.f32 %v1829_v51, %v1828_v50  ;;  %v1037_v58 = vpop.permute.xlu0 %1036  ;;  %v1886_v45 = vadd.f32 %v1885_v57, %v1884_v38  ;;  %v1831_v60 = vpop.f32.mrb[40].mxu0  ;;  %p2187_p3 = pnand %p2186_p2, %p2354_p4  ;;  %s2191_s8 = scalar_lea.vmem %s2190_s27, 2048 }
 0x16c   : > { %1370 = vst.msk [vmem:[%s3022_s17 + $0x8] sm:$0xff] %vm853_vm0, %v1336_v43  ;;  %v1341_v54 = vadd.f32 %v1883_v48, %v1236_v49  ;;  %v1832_v61 = vpop.f32.mrb[41].mxu0  ;;  %v1887_v62 = vpop.f32.mrb[40].mxu1  ;;  %v1141_v63 = vadd.f32 %v2960_v59, %v1037_v58  ;;  %p2192_p6 = scmp.lt.s32.totalorder %s3052_s15, %s2190_s27  ;;  %p2193_p7 = scmp.lt.s32.totalorder %s2191_s8, %s2185_s20 }
 0x16d   : > { %v1241_v47 = vadd.f32 %v1830_v55, %v1136_v53  ;;  %v1833_v0 = vadd.f32 %v1832_v61, %v1831_v60  ;;  %v1888_v3 = vpop.f32.mrb[41].mxu1  ;;  %v1042_v4 = vpop.permute.xlu1 %1041  ;;  %p2188_p5 = pneg %p2187_p3 }
 0x16e   : > { %1371 = vst.msk [vmem:[%s3022_s17 + $0x10] sm:$0xff] %vm853_vm0, %v1341_v54  ;;  %v1889_v52 = vadd.f32 %v1888_v3, %v1887_v62  ;;  %v1834_v6 = vpop.f32.mrb[42].mxu0  ;;  %v1890_v7 = vpop.f32.mrb[42].mxu1  ;;  %v1146_v9 = vadd.f32 %v2965_v2, %v1042_v4  ;;  %p2194_p9 = por %p2193_p7, %p2192_p6 }
 0x16f   : > { %v1346_v56 = vadd.f32 %v1886_v45, %v1241_v47  ;;  %v1246_v5 = vadd.f32 %v1833_v0, %v1141_v63  ;;  %v1835_v1 = vpop.f32.mrb[43].mxu0  ;;  %v1891_v13 = vpop.f32.mrb[43].mxu1 }
 0x170   : > { %v1836_v12 = vadd.f32 %v1835_v1, %v1834_v6  ;;  %v1047_v10 = vpop.permute.xlu0 %1046  ;;  %v1892_v59 = vadd.f32 %v1891_v13, %v1890_v7  ;;  %v1837_v15 = vpop.f32.mrb[44].mxu0  ;;  %p2195_p10 = pnand %p2194_p9, %p2188_p5 }
 0x171   : > { %1372 = vst.msk [vmem:[%s3022_s17 + $0x18] sm:$0xff] %vm853_vm0, %v1346_v56  ;;  %v1351_v11 = vadd.f32 %v1889_v52, %v1246_v5  ;;  %v1838_v17 = vpop.f32.mrb[45].mxu0  ;;  %v1893_v18 = vpop.f32.mrb[44].mxu1  ;;  %v1151_v19 = vadd.f32 %v2970_v8, %v1047_v10 }
 0x172   : > { %v1251_v14 = vadd.f32 %v1836_v12, %v1146_v9  ;;  %v1839_v21 = vadd.f32 %v1838_v17, %v1837_v15  ;;  %v1894_v22 = vpop.f32.mrb[45].mxu1  ;;  %v1052_v2 = vpop.permute.xlu1 %1051 }
 0x173   : > { %1373 = vst.msk [vmem:[%s3022_s17 + $0x20] sm:$0xff] %vm853_vm0, %v1351_v11  ;;  %v1895_v23 = vadd.f32 %v1894_v22, %v1893_v18  ;;  %v1840_v25 = vpop.f32.mrb[46].mxu0  ;;  %v1896_v27 = vpop.f32.mrb[46].mxu1  ;;  %v1156_v28 = vadd.f32 %v2977_v16, %v1052_v2 }
 0x174   : > { %v1356_v20 = vadd.f32 %v1892_v59, %v1251_v14  ;;  %v1256_v24 = vadd.f32 %v1839_v21, %v1151_v19  ;;  %v1841_v26 = vpop.f32.mrb[47].mxu0  ;;  %v1897_v31 = vpop.f32.mrb[47].mxu1 }
 0x175   : > { %v1842_v30 = vadd.f32 %v1841_v26, %v1840_v25  ;;  %v1898_v32 = vadd.f32 %v1897_v31, %v1896_v27 }
 0x176   : > { %1374 = vst.msk [vmem:[%s3022_s17 + $0x28] sm:$0xff] %vm853_vm0, %v1356_v20  ;;  %v1361_v8 = vadd.f32 %v1895_v23, %v1256_v24 }
 0x177   : > { %v1261_v33 = vadd.f32 %v1842_v30, %v1156_v28 }
 0x178   : > { %1375 = vst.msk [vmem:[%s3022_s17 + $0x30] sm:$0xff] %vm853_vm0, %v1361_v8 }
 0x179   : > { %v1366_v34 = vadd.f32 %v1898_v32, %v1261_v33 }
 0x17b   : > { %1376 = vst.msk [vmem:[%s3022_s17 + $0x38] sm:$0xff] %vm853_vm0, %v1366_v34 }
 0x17c   : > { %2198 = shalt.err (!%p2195_p10)
}
 0x17d   : > { %s2199_s17 = scalar_lea.hbm %s3050_s16, 1024  ;;  %s2203_s10 = scalar_lea.hbm %s3112_s7, 2048 }
 0x17e   : > { %p2200_p11 = scmp.ne.s32.totalorder %s3050_s16, %s2199_s17  ;;  %p2204_p0 = scmp.lt.u32.totalorder %s3050_s16, %s3112_s7 }
 0x17f   : > { %p2205_p1 = scmp.lt.u32.totalorder %s2203_s10, %s2199_s17  ;;  %p2207_p3 = scmp.lt.u32.totalorder %s2199_s17, %s3050_s16 }
 0x180   : > { %p2201_p12 = pnand %p2200_p11, %p2354_p4 }
 0x181   : > { %p2206_p2 = por %p2205_p1, %p2204_p0 }
 0x182   : > { %p2202_p13 = pneg %p2201_p12 }
 0x183   : > { %p2208_p5 = por %p2207_p3, %p2206_p2 }
 0x185   : > { %p2209_p6 = pnand %p2208_p5, %p2202_p13 }
 0x187   : > { %2212 = shalt.err (!%p2209_p6)
}
 0x188   : > { %2093 = dma.vmem_to_hbm [thread:$0]  (%p2354_p4), %s3052_s15, 1024, %s3050_s16, %s1383_s19, %s2271_s22, %s2271_s22, %s2272_s12  }
 0x189 PF: > { %p2103_p7 = scmp.ge.s32.totalorder %s2267_s29, 2  ;;  %s1429_s20 = sand.u32 1, %s2247_s24  }
 0x18a   : > { %s1430_s8 = scalar_lea.sflag [#allocation3], %s1429_s20 }
 0x18b   : > { %p2097_p9 = pnand %p2103_p7, %p2361_p8 }
 0x18d   : > { %2238 = dma.done.wait (!%p2097_p9), %s1430_s8, 1024  }
 0x18e   : > { %2240 = vsyncadd (!%p2097_p9), %s1430_s8, 4294966272  ;;  %s1439_s11 = scalar_lea.sflag [#allocation5], %s1429_s20 }
 0x18f   : > { %2242 = dma.done.wait (!%p2097_p9), %s1439_s11, 1024  }
 0x190   : > { %2244 = vsyncadd (!%p2097_p9), %s1439_s11, 4294966272  ;;  %s24_s29 = sadd.s32 1, %s2267_s29   ;;  %s3117_s24 = smov %s2251_s25 }
 0x191   : > { %p21_p10 = scmp.ge.s32.totalorder %s24_s29, 4   ;;  %s3118_s25 = smov %s2255_s26 }
 0x192   : > { %s3119_s26 = smov %s2367_s14  ;;  %s3120_s27 = smov %s2263_s28 }
 0x193   : > { %s3121_s28 = smov %s3123_s9  ;;  %23 = sbr.rel (!%p21_p10) target bundleno = 6 (0x6), region = 99 }
 0x19a   :  { %1444 = vsyncpa [#allocation3], 1 }
 0x19b   :  { %1446 = vsyncpa [#allocation3 + $0x1], 1 }
 0x19c   :  { %1447 = vsyncpa [#allocation5], 1 }
 0x19d   :  { %1449 = vsyncpa [#allocation5 + $0x1], 1 }

</bundles_post_ra>
